<compile_context>
chip_gen: v7x
topology: tpu7x:2x2x1
jax: 0.10.0
libtpu: 0.0.40
codegen_flags: <defaults>
</compile_context>

<pallas_src>
import math

import jax
import jax.numpy as jnp
from jax.experimental import pallas as pl
from jax.experimental.pallas import tpu as pltpu

# ----- configuration (small synthetic shapes consistent with the module) -----
B = 2              # batch
S = 8              # sequence length
D_IN = 16          # input_size (!= hidden -> input_proj_layer exists)
H = 32             # hidden_size
NUM_HEADS = 4
HEAD_DIM = H // NUM_HEADS
FF = 64            # feed-forward inner dim
NUM_LAYERS = 2
SCALE = 1.0 / math.sqrt(HEAD_DIM)
LN_EPS = 1e-5
BS = B * S
NEG_INF = -1e9


# --------------------------- helper (plain JAX glue) --------------------------
def positional_features(seq_len, hidden, min_timescale=1.0, max_timescale=1.0e4):
    """AllenNLP add_positional_features sinusoid table, shape (seq_len, hidden)."""
    timesteps = jnp.arange(seq_len, dtype=jnp.float32)
    num_timescales = hidden // 2
    ts = jnp.arange(num_timescales, dtype=jnp.float32)
    log_inc = math.log(max_timescale / min_timescale) / float(num_timescales - 1)
    inv = min_timescale * jnp.exp(ts * -log_inc)
    scaled = timesteps[:, None] * inv[None, :]
    sin_cos = jnp.concatenate([jnp.sin(scaled), jnp.cos(scaled)], axis=1)
    if hidden % 2 != 0:
        sin_cos = jnp.concatenate(
            [sin_cos, jnp.zeros((seq_len, 1), jnp.float32)], axis=1)
    return sin_cos


# --------------------------------- the kernel ---------------------------------
def encoder_kernel(x_ref, bias_ref, pos_ref, wp_ref, gvec_ref,
                   wqkv_ref, bqkv_ref, wo_ref, vec_ref,
                   w1_ref, b1_ref, w2_ref, out_ref):
    f32 = jnp.float32
    bf16 = jnp.bfloat16

    def layer_norm(y, w, b):
        mu = jnp.mean(y, axis=-1, keepdims=True)
        var = jnp.mean(jnp.square(y - mu), axis=-1, keepdims=True)
        return (y - mu) * jax.lax.rsqrt(var + LN_EPS) * w + b

    # input projection (input_size != hidden_size) + positional features,
    # whole (B*S, H) slab at once; bf16 MXU inputs, f32 accumulate.
    bp = gvec_ref[0:1, :]                                             # (1, H)
    h = (jnp.dot(x_ref[...], wp_ref[...], preferred_element_type=f32)
         + bp + pos_ref[...])                                         # (BS,H) f32

    # Additive attention bias (padding + block-diagonal cross-batch mask).
    # No materialized per-head broadcast: implicit (1, BS, BS) broadcast in
    # the add inside the loop.
    bias3 = bias_ref[...][None, :, :]                                 # (1,BS,BS)

    for l in range(NUM_LAYERS):
        vecs = vec_ref[l]                                             # (6, H)
        ln1w, ln1b = vecs[0:1, :], vecs[1:2, :]
        ln2w, ln2b = vecs[2:3, :], vecs[3:4, :]
        bo, b2 = vecs[4:5, :], vecs[5:6, :]

        # ---------------- pre-norm multi-head self-attention ----------------
        y = layer_norm(h, ln1w, ln1b)                                 # (BS,H) f32
        # Single fused QKV matmul: (BS,H) @ (H,3H) -> (BS,3H), bias added on
        # the lane-dense fused slab.
        qkv = (jnp.dot(y.astype(bf16), wqkv_ref[l],
                       preferred_element_type=f32) + bqkv_ref[l])     # (BS,3H)

        # Scale q on the lane-dense (BS,H) slab, then split to per-head layout
        # only for the two attention einsums.
        q = qkv[:, 0 * H:1 * H] * SCALE
        k = qkv[:, 1 * H:2 * H]
        v = qkv[:, 2 * H:3 * H]
        qh = jnp.swapaxes(q.reshape(BS, NUM_HEADS, HEAD_DIM), 0, 1)   # (NH,BS,HD)
        kh = jnp.swapaxes(k.reshape(BS, NUM_HEADS, HEAD_DIM), 0, 1)
        vh = jnp.swapaxes(v.reshape(BS, NUM_HEADS, HEAD_DIM), 0, 1)

        scores = jnp.einsum('ntd,nud->ntu', qh.astype(bf16), kh.astype(bf16),
                            preferred_element_type=f32)               # (NH,BS,BS)
        scores = scores + bias3
        scores = scores - jnp.max(scores, axis=-1, keepdims=True)
        p = jnp.exp(scores)                                           # f32
        p = p * pl.reciprocal(jnp.sum(p, axis=-1, keepdims=True), approx=True)

        o = jnp.einsum('ntu,nud->ntd', p.astype(bf16), vh.astype(bf16),
                       preferred_element_type=f32)                    # (NH,BS,HD)
        # Fold heads back into the lane dim, single (BS,H)@(H,H) projection.
        o_slab = jnp.swapaxes(o, 0, 1).reshape(BS, H)                 # (BS,H)
        attn = (jnp.dot(o_slab.astype(bf16), wo_ref[l],
                        preferred_element_type=f32) + bo)             # (BS,H)
        h = h + attn                                                  # residual

        # ------------------------ pre-norm feed-forward ---------------------
        y = layer_norm(h, ln2w, ln2b)
        ff = (jnp.dot(y.astype(bf16), w1_ref[l],
                      preferred_element_type=f32) + b1_ref[l])        # (BS,FF)
        ff = jnp.maximum(ff, 0.0)                                     # ReLU
        ff = (jnp.dot(ff.astype(bf16), w2_ref[l],
                      preferred_element_type=f32) + b2)               # (BS,H)
        h = h + ff                                                    # residual

    # final_norm (prenorm => norm3 clone)
    h = layer_norm(h, gvec_ref[1:2, :], gvec_ref[2:3, :])
    out_ref[...] = h


# ------------------------------ wrapper / call --------------------------------
def miso_transformer_encoder(x, mask, params):
    """x: (B, S, D_IN) float32, mask: (B, S) with 1 = real token, 0 = padding."""
    p = params

    # --- pure-JAX layout plumbing (outside the kernel) ---
    x2d = x.reshape(BS, D_IN).astype(jnp.bfloat16)
    pos = positional_features(S, H)
    pos_tiled = jnp.tile(pos, (B, 1))                                 # (BS, H)

    valid = mask.reshape(BS).astype(jnp.float32) > 0.5                # (BS,)
    batch_id = jnp.repeat(jnp.arange(B), S)                           # (BS,)
    allowed = (batch_id[:, None] == batch_id[None, :]) & valid[None, :]
    attn_bias = jnp.where(allowed, 0.0, NEG_INF).astype(jnp.float32)  # (BS, BS)

    # Fused QKV weights/biases: (NL, H, 3H) / (NL, 1, 3H).  No (...,8)-last-dim
    # arrays anywhere; matmul weights cast to bf16 for the MXU.
    wqkv = jnp.concatenate([p["wq"], p["wk"], p["wv"]],
                           axis=-1).astype(jnp.bfloat16)              # (NL,H,3H)
    bqkv = jnp.concatenate([p["bq"], p["bk"], p["bv"]], axis=-1)      # (NL,1,3H)
    wp = p["wp"].astype(jnp.bfloat16)                                 # (D_IN,H)
    wo = p["wo"].astype(jnp.bfloat16)                                 # (NL,H,H)
    w1 = p["w1"].astype(jnp.bfloat16)                                 # (NL,H,FF)
    w2 = p["w2"].astype(jnp.bfloat16)                                 # (NL,FF,H)

    # pack small per-layer vectors into one table, globals into another
    vecs = jnp.concatenate([p["ln1w"], p["ln1b"], p["ln2w"], p["ln2b"],
                            p["bo"], p["b2"]], axis=1)                # (NL, 6, H)
    gvec = jnp.concatenate([p["bp"], p["lnfw"], p["lnfb"]], axis=0)   # (3, H)

    n_inputs = 12
    vmem_spec = [pl.BlockSpec(memory_space=pltpu.MemorySpace.VMEM)
                 for _ in range(n_inputs)]

    # single program: no grid, everything resident in VMEM (tiny problem size)
    out2d = pl.pallas_call(
        encoder_kernel,
        out_shape=jax.ShapeDtypeStruct((BS, H), jnp.float32),
        in_specs=vmem_spec,
        out_specs=pl.BlockSpec(memory_space=pltpu.MemorySpace.VMEM),
    )(x2d, attn_bias, pos_tiled, wp, gvec,
      wqkv, bqkv, wo, vecs, w1, p["b1"], w2)
    return out2d.reshape(B, S, H)


# ------------------------- deterministic parameter init -----------------------
def init_params(key):
    ks = jax.random.split(key, 14)

    def rnd(k, shape, scale=0.05):
        return scale * jax.random.normal(k, shape, dtype=jnp.float32)

    p = {
        "wp": rnd(ks[0], (D_IN, H)),
        "bp": rnd(ks[1], (1, H)),
        "wq": rnd(ks[2], (NUM_LAYERS, H, H)),
        "bq": rnd(ks[3], (NUM_LAYERS, 1, H)),
        "wk": rnd(ks[4], (NUM_LAYERS, H, H)),
        "bk": rnd(ks[5], (NUM_LAYERS, 1, H)),
        "wv": rnd(ks[6], (NUM_LAYERS, H, H)),
        "bv": rnd(ks[7], (NUM_LAYERS, 1, H)),
        "wo": rnd(ks[8], (NUM_LAYERS, H, H)),
        "bo": rnd(ks[9], (NUM_LAYERS, 1, H)),
        "ln1w": jnp.ones((NUM_LAYERS, 1, H), jnp.float32),
        "ln1b": jnp.zeros((NUM_LAYERS, 1, H), jnp.float32),
        "ln2w": jnp.ones((NUM_LAYERS, 1, H), jnp.float32),
        "ln2b": jnp.zeros((NUM_LAYERS, 1, H), jnp.float32),
        "w1": rnd(ks[10], (NUM_LAYERS, H, FF)),
        "b1": rnd(ks[11], (NUM_LAYERS, 1, FF)),
        "w2": rnd(ks[12], (NUM_LAYERS, FF, H)),
        "b2": rnd(ks[13], (NUM_LAYERS, 1, H)),
        "lnfw": jnp.ones((1, H), jnp.float32),
        "lnfb": jnp.zeros((1, H), jnp.float32),
    }
    return p


# ----------------------------- pure-JAX reference ------------------------------
def ref_forward(x, mask, p):
    def layer_norm(y, w, b):
        mu = jnp.mean(y, axis=-1, keepdims=True)
        var = jnp.mean(jnp.square(y - mu), axis=-1, keepdims=True)
        return (y - mu) * jax.lax.rsqrt(var + LN_EPS) * w + b

    pos = positional_features(S, H)
    h = x @ p["wp"] + p["bp"]
    h = h + pos[None]
    key_bias = jnp.where(mask.astype(jnp.float32) > 0.5, 0.0, NEG_INF)  # (B, S)
    key_bias = key_bias[:, None, None, :]                               # (B,1,1,S)
    for l in range(NUM_LAYERS):
        y = layer_norm(h, p["ln1w"][l], p["ln1b"][l])
        q = y @ p["wq"][l] + p["bq"][l]
        k = y @ p["wk"][l] + p["bk"][l]
        v = y @ p["wv"][l] + p["bv"][l]
        qh = q.reshape(B, S, NUM_HEADS, HEAD_DIM).transpose(0, 2, 1, 3)
        kh = k.reshape(B, S, NUM_HEADS, HEAD_DIM).transpose(0, 2, 1, 3)
        vh = v.reshape(B, S, NUM_HEADS, HEAD_DIM).transpose(0, 2, 1, 3)
        scores = jnp.einsum("bhqd,bhkd->bhqk", qh, kh) * SCALE + key_bias
        pr = jax.nn.softmax(scores, axis=-1)
        attn = jnp.einsum("bhqk,bhkd->bhqd", pr, vh)
        attn = attn.transpose(0, 2, 1, 3).reshape(B, S, H)
        attn = attn @ p["wo"][l] + p["bo"][l]
        h = h + attn
        y = layer_norm(h, p["ln2w"][l], p["ln2b"][l])
        ff = jax.nn.relu(y @ p["w1"][l] + p["b1"][l]) @ p["w2"][l] + p["b2"][l]
        h = h + ff
    return layer_norm(h, p["lnfw"], p["lnfb"])


# ------------------------------------ main -------------------------------------
if __name__ == "__main__":
    key = jax.random.PRNGKey(0)
    kx, kp = jax.random.split(key)
    x = jax.random.normal(kx, (B, S, D_IN), dtype=jnp.float32)
    mask = jnp.ones((B, S), dtype=jnp.int32)
    mask = mask.at[1, 6:].set(0)          # last two positions of batch 1 are padding
    params = init_params(kp)

    out = miso_transformer_encoder(x, mask, params)
    out = jax.block_until_ready(out)

    ref = ref_forward(x, mask, params)
    assert out.shape == (B, S, H)
    assert bool(jnp.all(jnp.isfinite(out)))
    max_err = float(jnp.max(jnp.abs(out - ref)))
    if not jnp.allclose(out, ref, atol=2e-2, rtol=2e-2):
        raise AssertionError(f"kernel/reference mismatch, max abs err = {max_err}")
    print("KERNEL_OK")
</pallas_src>

<mosaic_0001>
module attributes {stable_mosaic.version = 11 : i64} {
  func.func @encoder_kernel(%arg0: memref<16x16xbf16, #tpu.memory_space<vmem>>, %arg1: memref<16x16xf32, #tpu.memory_space<vmem>>, %arg2: memref<16x32xf32, #tpu.memory_space<vmem>>, %arg3: memref<16x32xbf16, #tpu.memory_space<vmem>>, %arg4: memref<3x32xf32, #tpu.memory_space<vmem>>, %arg5: memref<2x32x96xbf16, #tpu.memory_space<vmem>>, %arg6: memref<2x1x96xf32, #tpu.memory_space<vmem>>, %arg7: memref<2x32x32xbf16, #tpu.memory_space<vmem>>, %arg8: memref<2x6x32xf32, #tpu.memory_space<vmem>>, %arg9: memref<2x32x64xbf16, #tpu.memory_space<vmem>>, %arg10: memref<2x1x64xf32, #tpu.memory_space<vmem>>, %arg11: memref<2x64x32xbf16, #tpu.memory_space<vmem>>, %arg12: memref<16x32xf32, #tpu.memory_space<vmem>>) attributes {dimension_semantics = [], scalar_prefetch = 0 : i64, scratch_operands = 0 : i64, tpu.core_type = #tpu.core_type<tc>} {
    %c0 = arith.constant 0 : index
    %c0_0 = arith.constant 0 : index
    %0 = vector.load %arg4[%c0, %c0_0] : memref<3x32xf32, #tpu.memory_space<vmem>>, vector<1x32xf32>
    %c0_1 = arith.constant 0 : index
    %c0_2 = arith.constant 0 : index
    %1 = vector.load %arg0[%c0_1, %c0_2] : memref<16x16xbf16, #tpu.memory_space<vmem>>, vector<16x16xbf16>
    %c0_3 = arith.constant 0 : index
    %c0_4 = arith.constant 0 : index
    %2 = vector.load %arg3[%c0_3, %c0_4] : memref<16x32xbf16, #tpu.memory_space<vmem>>, vector<16x32xbf16>
    %cst = arith.constant dense<0.000000e+00> : vector<16x32xf32>
    %3 = tpu.matmul %1, %2, %cst {dimension_numbers = #tpu.dot_dimension_numbers<[1], [0], [0], [1], [0, 0, 1, 1], [], []>} : vector<16x16xbf16>, vector<16x32xbf16>, vector<16x32xf32> -> vector<16x32xf32>
    %4 = vector.broadcast %0 : vector<1x32xf32> to vector<16x32xf32>
    %5 = arith.addf %3, %4 : vector<16x32xf32>
    %c0_5 = arith.constant 0 : index
    %c0_6 = arith.constant 0 : index
    %6 = vector.load %arg2[%c0_5, %c0_6] : memref<16x32xf32, #tpu.memory_space<vmem>>, vector<16x32xf32>
    %7 = arith.addf %5, %6 : vector<16x32xf32>
    %c0_7 = arith.constant 0 : index
    %c0_8 = arith.constant 0 : index
    %8 = vector.load %arg1[%c0_7, %c0_8] : memref<16x16xf32, #tpu.memory_space<vmem>>, vector<16x16xf32>
    %9 = vector.shape_cast %8 : vector<16x16xf32> to vector<1x16x16xf32>
    %c0_9 = arith.constant 0 : index
    %c0_10 = arith.constant 0 : index
    %c0_11 = arith.constant 0 : index
    %10 = vector.load %arg8[%c0_9, %c0_10, %c0_11] : memref<2x6x32xf32, #tpu.memory_space<vmem>>, vector<1x6x32xf32>
    %11 = vector.shape_cast %10 : vector<1x6x32xf32> to vector<6x32xf32>
    %12 = vector.extract_strided_slice %11 {offsets = [0, 0], sizes = [1, 32], strides = [1, 1]} : vector<6x32xf32> to vector<1x32xf32>
    %13 = vector.extract_strided_slice %11 {offsets = [1, 0], sizes = [1, 32], strides = [1, 1]} : vector<6x32xf32> to vector<1x32xf32>
    %14 = vector.extract_strided_slice %11 {offsets = [2, 0], sizes = [1, 32], strides = [1, 1]} : vector<6x32xf32> to vector<1x32xf32>
    %15 = vector.extract_strided_slice %11 {offsets = [3, 0], sizes = [1, 32], strides = [1, 1]} : vector<6x32xf32> to vector<1x32xf32>
    %16 = vector.extract_strided_slice %11 {offsets = [4, 0], sizes = [1, 32], strides = [1, 1]} : vector<6x32xf32> to vector<1x32xf32>
    %17 = vector.extract_strided_slice %11 {offsets = [5, 0], sizes = [1, 32], strides = [1, 1]} : vector<6x32xf32> to vector<1x32xf32>
    %cst_12 = arith.constant dense<0.000000e+00> : vector<16xf32>
    %18 = vector.multi_reduction <add>, %7, %cst_12 [1] : vector<16x32xf32> to vector<16xf32>
    %19 = vector.shape_cast %18 : vector<16xf32> to vector<16x1xf32>
    %cst_13 = arith.constant 3.200000e+01 : f32
    %20 = vector.broadcast %cst_13 : f32 to vector<16x1xf32>
    %21 = arith.divf %19, %20 : vector<16x1xf32>
    %22 = vector.broadcast %21 : vector<16x1xf32> to vector<16x32xf32>
    %23 = arith.subf %7, %22 : vector<16x32xf32>
    %24 = arith.mulf %23, %23 : vector<16x32xf32>
    %cst_14 = arith.constant dense<0.000000e+00> : vector<16xf32>
    %25 = vector.multi_reduction <add>, %24, %cst_14 [1] : vector<16x32xf32> to vector<16xf32>
    %26 = vector.shape_cast %25 : vector<16xf32> to vector<16x1xf32>
    %cst_15 = arith.constant 3.200000e+01 : f32
    %27 = vector.broadcast %cst_15 : f32 to vector<16x1xf32>
    %28 = arith.divf %26, %27 : vector<16x1xf32>
    %29 = vector.broadcast %21 : vector<16x1xf32> to vector<16x32xf32>
    %30 = arith.subf %7, %29 : vector<16x32xf32>
    %cst_16 = arith.constant 9.99999974E-6 : f32
    %31 = vector.broadcast %cst_16 : f32 to vector<16x1xf32>
    %32 = arith.addf %28, %31 : vector<16x1xf32>
    %33 = math.rsqrt %32 : vector<16x1xf32>
    %34 = vector.broadcast %33 : vector<16x1xf32> to vector<16x32xf32>
    %35 = arith.mulf %30, %34 : vector<16x32xf32>
    %36 = vector.broadcast %12 : vector<1x32xf32> to vector<16x32xf32>
    %37 = arith.mulf %35, %36 : vector<16x32xf32>
    %38 = vector.broadcast %13 : vector<1x32xf32> to vector<16x32xf32>
    %39 = arith.addf %37, %38 : vector<16x32xf32>
    %40 = arith.truncf %39 : vector<16x32xf32> to vector<16x32xbf16>
    %c0_17 = arith.constant 0 : index
    %c0_18 = arith.constant 0 : index
    %c0_19 = arith.constant 0 : index
    %41 = vector.load %arg5[%c0_17, %c0_18, %c0_19] : memref<2x32x96xbf16, #tpu.memory_space<vmem>>, vector<1x32x96xbf16>
    %42 = vector.shape_cast %41 : vector<1x32x96xbf16> to vector<32x96xbf16>
    %cst_20 = arith.constant dense<0.000000e+00> : vector<16x96xf32>
    %43 = tpu.matmul %40, %42, %cst_20 {dimension_numbers = #tpu.dot_dimension_numbers<[1], [0], [0], [1], [0, 0, 1, 1], [], []>} : vector<16x32xbf16>, vector<32x96xbf16>, vector<16x96xf32> -> vector<16x96xf32>
    %c0_21 = arith.constant 0 : index
    %c0_22 = arith.constant 0 : index
    %c0_23 = arith.constant 0 : index
    %44 = vector.load %arg6[%c0_21, %c0_22, %c0_23] : memref<2x1x96xf32, #tpu.memory_space<vmem>>, vector<1x1x96xf32>
    %45 = vector.shape_cast %44 : vector<1x1x96xf32> to vector<1x96xf32>
    %46 = vector.broadcast %45 : vector<1x96xf32> to vector<16x96xf32>
    %47 = arith.addf %43, %46 : vector<16x96xf32>
    %48 = vector.extract_strided_slice %47 {offsets = [0, 0], sizes = [16, 32], strides = [1, 1]} : vector<16x96xf32> to vector<16x32xf32>
    %cst_24 = arith.constant 0.353553385 : f32
    %49 = vector.broadcast %cst_24 : f32 to vector<16x32xf32>
    %50 = arith.mulf %48, %49 : vector<16x32xf32>
    %51 = vector.extract_strided_slice %47 {offsets = [0, 32], sizes = [16, 32], strides = [1, 1]} : vector<16x96xf32> to vector<16x32xf32>
    %52 = vector.extract_strided_slice %47 {offsets = [0, 64], sizes = [16, 32], strides = [1, 1]} : vector<16x96xf32> to vector<16x32xf32>
    %53 = vector.shape_cast %50 : vector<16x32xf32> to vector<16x4x8xf32>
    %54 = tpu.transpose %53, [1, 0, 2] : vector<16x4x8xf32> -> vector<4x16x8xf32>
    %55 = vector.shape_cast %51 : vector<16x32xf32> to vector<16x4x8xf32>
    %56 = tpu.transpose %55, [1, 0, 2] : vector<16x4x8xf32> -> vector<4x16x8xf32>
    %57 = vector.shape_cast %52 : vector<16x32xf32> to vector<16x4x8xf32>
    %58 = tpu.transpose %57, [1, 0, 2] : vector<16x4x8xf32> -> vector<4x16x8xf32>
    %59 = arith.truncf %54 : vector<4x16x8xf32> to vector<4x16x8xbf16>
    %60 = arith.truncf %56 : vector<4x16x8xf32> to vector<4x16x8xbf16>
    "tpu.trace_start"() <{level = 10 : i32, message = "ntd,nud->ntu"}> : () -> ()
    %cst_25 = arith.constant dense<0.000000e+00> : vector<4x16x16xf32>
    %61 = tpu.matmul %59, %60, %cst_25 {dimension_numbers = #tpu.dot_dimension_numbers<[2], [2], [1], [1], [0, 0, 0, 1, 1, 1], [0], [0]>} : vector<4x16x8xbf16>, vector<4x16x8xbf16>, vector<4x16x16xf32> -> vector<4x16x16xf32>
    "tpu.trace_stop"() : () -> ()
    %62 = vector.broadcast %9 : vector<1x16x16xf32> to vector<4x16x16xf32>
    %63 = arith.addf %61, %62 : vector<4x16x16xf32>
    %cst_26 = arith.constant dense<0xFF800000> : vector<4x16xf32>
    %64 = vector.multi_reduction <maximumf>, %63, %cst_26 [2] : vector<4x16x16xf32> to vector<4x16xf32>
    %65 = vector.shape_cast %64 : vector<4x16xf32> to vector<4x16x1xf32>
    %66 = vector.broadcast %65 : vector<4x16x1xf32> to vector<4x16x16xf32>
    %67 = arith.subf %63, %66 : vector<4x16x16xf32>
    %68 = math.exp %67 : vector<4x16x16xf32>
    %cst_27 = arith.constant dense<0.000000e+00> : vector<4x16xf32>
    %69 = vector.multi_reduction <add>, %68, %cst_27 [2] : vector<4x16x16xf32> to vector<4x16xf32>
    %70 = vector.shape_cast %69 : vector<4x16xf32> to vector<4x16x1xf32>
    %71 = tpu.reciprocal %70 {approx = true} : vector<4x16x1xf32> -> vector<4x16x1xf32>
    %72 = vector.broadcast %71 : vector<4x16x1xf32> to vector<4x16x16xf32>
    %73 = arith.mulf %68, %72 : vector<4x16x16xf32>
    %74 = arith.truncf %73 : vector<4x16x16xf32> to vector<4x16x16xbf16>
    %75 = arith.truncf %58 : vector<4x16x8xf32> to vector<4x16x8xbf16>
    "tpu.trace_start"() <{level = 10 : i32, message = "ntu,nud->ntd"}> : () -> ()
    %cst_28 = arith.constant dense<0.000000e+00> : vector<4x16x8xf32>
    %76 = tpu.matmul %74, %75, %cst_28 {dimension_numbers = #tpu.dot_dimension_numbers<[2], [1], [1], [2], [0, 0, 0, 1, 1, 2], [0], [0]>} : vector<4x16x16xbf16>, vector<4x16x8xbf16>, vector<4x16x8xf32> -> vector<4x16x8xf32>
    "tpu.trace_stop"() : () -> ()
    %77 = tpu.transpose %76, [1, 0, 2] : vector<4x16x8xf32> -> vector<16x4x8xf32>
    %78 = vector.shape_cast %77 : vector<16x4x8xf32> to vector<16x32xf32>
    %79 = arith.truncf %78 : vector<16x32xf32> to vector<16x32xbf16>
    %c0_29 = arith.constant 0 : index
    %c0_30 = arith.constant 0 : index
    %c0_31 = arith.constant 0 : index
    %80 = vector.load %arg7[%c0_29, %c0_30, %c0_31] : memref<2x32x32xbf16, #tpu.memory_space<vmem>>, vector<1x32x32xbf16>
    %81 = vector.shape_cast %80 : vector<1x32x32xbf16> to vector<32x32xbf16>
    %cst_32 = arith.constant dense<0.000000e+00> : vector<16x32xf32>
    %82 = tpu.matmul %79, %81, %cst_32 {dimension_numbers = #tpu.dot_dimension_numbers<[1], [0], [0], [1], [0, 0, 1, 1], [], []>} : vector<16x32xbf16>, vector<32x32xbf16>, vector<16x32xf32> -> vector<16x32xf32>
    %83 = vector.broadcast %16 : vector<1x32xf32> to vector<16x32xf32>
    %84 = arith.addf %82, %83 : vector<16x32xf32>
    %85 = arith.addf %7, %84 : vector<16x32xf32>
    %cst_33 = arith.constant dense<0.000000e+00> : vector<16xf32>
    %86 = vector.multi_reduction <add>, %85, %cst_33 [1] : vector<16x32xf32> to vector<16xf32>
    %87 = vector.shape_cast %86 : vector<16xf32> to vector<16x1xf32>
    %cst_34 = arith.constant 3.200000e+01 : f32
    %88 = vector.broadcast %cst_34 : f32 to vector<16x1xf32>
    %89 = arith.divf %87, %88 : vector<16x1xf32>
    %90 = vector.broadcast %89 : vector<16x1xf32> to vector<16x32xf32>
    %91 = arith.subf %85, %90 : vector<16x32xf32>
    %92 = arith.mulf %91, %91 : vector<16x32xf32>
    %cst_35 = arith.constant dense<0.000000e+00> : vector<16xf32>
    %93 = vector.multi_reduction <add>, %92, %cst_35 [1] : vector<16x32xf32> to vector<16xf32>
    %94 = vector.shape_cast %93 : vector<16xf32> to vector<16x1xf32>
    %cst_36 = arith.constant 3.200000e+01 : f32
    %95 = vector.broadcast %cst_36 : f32 to vector<16x1xf32>
    %96 = arith.divf %94, %95 : vector<16x1xf32>
    %97 = vector.broadcast %89 : vector<16x1xf32> to vector<16x32xf32>
    %98 = arith.subf %85, %97 : vector<16x32xf32>
    %cst_37 = arith.constant 9.99999974E-6 : f32
    %99 = vector.broadcast %cst_37 : f32 to vector<16x1xf32>
    %100 = arith.addf %96, %99 : vector<16x1xf32>
    %101 = math.rsqrt %100 : vector<16x1xf32>
    %102 = vector.broadcast %101 : vector<16x1xf32> to vector<16x32xf32>
    %103 = arith.mulf %98, %102 : vector<16x32xf32>
    %104 = vector.broadcast %14 : vector<1x32xf32> to vector<16x32xf32>
    %105 = arith.mulf %103, %104 : vector<16x32xf32>
    %106 = vector.broadcast %15 : vector<1x32xf32> to vector<16x32xf32>
    %107 = arith.addf %105, %106 : vector<16x32xf32>
    %108 = arith.truncf %107 : vector<16x32xf32> to vector<16x32xbf16>
    %c0_38 = arith.constant 0 : index
    %c0_39 = arith.constant 0 : index
    %c0_40 = arith.constant 0 : index
    %109 = vector.load %arg9[%c0_38, %c0_39, %c0_40] : memref<2x32x64xbf16, #tpu.memory_space<vmem>>, vector<1x32x64xbf16>
    %110 = vector.shape_cast %109 : vector<1x32x64xbf16> to vector<32x64xbf16>
    %cst_41 = arith.constant dense<0.000000e+00> : vector<16x64xf32>
    %111 = tpu.matmul %108, %110, %cst_41 {dimension_numbers = #tpu.dot_dimension_numbers<[1], [0], [0], [1], [0, 0, 1, 1], [], []>} : vector<16x32xbf16>, vector<32x64xbf16>, vector<16x64xf32> -> vector<16x64xf32>
    %c0_42 = arith.constant 0 : index
    %c0_43 = arith.constant 0 : index
    %c0_44 = arith.constant 0 : index
    %112 = vector.load %arg10[%c0_42, %c0_43, %c0_44] : memref<2x1x64xf32, #tpu.memory_space<vmem>>, vector<1x1x64xf32>
    %113 = vector.shape_cast %112 : vector<1x1x64xf32> to vector<1x64xf32>
    %114 = vector.broadcast %113 : vector<1x64xf32> to vector<16x64xf32>
    %115 = arith.addf %111, %114 : vector<16x64xf32>
    %cst_45 = arith.constant 0.000000e+00 : f32
    %116 = vector.broadcast %cst_45 : f32 to vector<16x64xf32>
    %117 = arith.maximumf %115, %116 : vector<16x64xf32>
    %118 = arith.truncf %117 : vector<16x64xf32> to vector<16x64xbf16>
    %c0_46 = arith.constant 0 : index
    %c0_47 = arith.constant 0 : index
    %c0_48 = arith.constant 0 : index
    %119 = vector.load %arg11[%c0_46, %c0_47, %c0_48] : memref<2x64x32xbf16, #tpu.memory_space<vmem>>, vector<1x64x32xbf16>
    %120 = vector.shape_cast %119 : vector<1x64x32xbf16> to vector<64x32xbf16>
    %cst_49 = arith.constant dense<0.000000e+00> : vector<16x32xf32>
    %121 = tpu.matmul %118, %120, %cst_49 {dimension_numbers = #tpu.dot_dimension_numbers<[1], [0], [0], [1], [0, 0, 1, 1], [], []>} : vector<16x64xbf16>, vector<64x32xbf16>, vector<16x32xf32> -> vector<16x32xf32>
    %122 = vector.broadcast %17 : vector<1x32xf32> to vector<16x32xf32>
    %123 = arith.addf %121, %122 : vector<16x32xf32>
    %124 = arith.addf %85, %123 : vector<16x32xf32>
    %c1 = arith.constant 1 : index
    %c0_50 = arith.constant 0 : index
    %c0_51 = arith.constant 0 : index
    %125 = vector.load %arg8[%c1, %c0_50, %c0_51] : memref<2x6x32xf32, #tpu.memory_space<vmem>>, vector<1x6x32xf32>
    %126 = vector.shape_cast %125 : vector<1x6x32xf32> to vector<6x32xf32>
    %127 = vector.extract_strided_slice %126 {offsets = [0, 0], sizes = [1, 32], strides = [1, 1]} : vector<6x32xf32> to vector<1x32xf32>
    %128 = vector.extract_strided_slice %126 {offsets = [1, 0], sizes = [1, 32], strides = [1, 1]} : vector<6x32xf32> to vector<1x32xf32>
    %129 = vector.extract_strided_slice %126 {offsets = [2, 0], sizes = [1, 32], strides = [1, 1]} : vector<6x32xf32> to vector<1x32xf32>
    %130 = vector.extract_strided_slice %126 {offsets = [3, 0], sizes = [1, 32], strides = [1, 1]} : vector<6x32xf32> to vector<1x32xf32>
    %131 = vector.extract_strided_slice %126 {offsets = [4, 0], sizes = [1, 32], strides = [1, 1]} : vector<6x32xf32> to vector<1x32xf32>
    %132 = vector.extract_strided_slice %126 {offsets = [5, 0], sizes = [1, 32], strides = [1, 1]} : vector<6x32xf32> to vector<1x32xf32>
    %cst_52 = arith.constant dense<0.000000e+00> : vector<16xf32>
    %133 = vector.multi_reduction <add>, %124, %cst_52 [1] : vector<16x32xf32> to vector<16xf32>
    %134 = vector.shape_cast %133 : vector<16xf32> to vector<16x1xf32>
    %cst_53 = arith.constant 3.200000e+01 : f32
    %135 = vector.broadcast %cst_53 : f32 to vector<16x1xf32>
    %136 = arith.divf %134, %135 : vector<16x1xf32>
    %137 = vector.broadcast %136 : vector<16x1xf32> to vector<16x32xf32>
    %138 = arith.subf %124, %137 : vector<16x32xf32>
    %139 = arith.mulf %138, %138 : vector<16x32xf32>
    %cst_54 = arith.constant dense<0.000000e+00> : vector<16xf32>
    %140 = vector.multi_reduction <add>, %139, %cst_54 [1] : vector<16x32xf32> to vector<16xf32>
    %141 = vector.shape_cast %140 : vector<16xf32> to vector<16x1xf32>
    %cst_55 = arith.constant 3.200000e+01 : f32
    %142 = vector.broadcast %cst_55 : f32 to vector<16x1xf32>
    %143 = arith.divf %141, %142 : vector<16x1xf32>
    %144 = vector.broadcast %136 : vector<16x1xf32> to vector<16x32xf32>
    %145 = arith.subf %124, %144 : vector<16x32xf32>
    %cst_56 = arith.constant 9.99999974E-6 : f32
    %146 = vector.broadcast %cst_56 : f32 to vector<16x1xf32>
    %147 = arith.addf %143, %146 : vector<16x1xf32>
    %148 = math.rsqrt %147 : vector<16x1xf32>
    %149 = vector.broadcast %148 : vector<16x1xf32> to vector<16x32xf32>
    %150 = arith.mulf %145, %149 : vector<16x32xf32>
    %151 = vector.broadcast %127 : vector<1x32xf32> to vector<16x32xf32>
    %152 = arith.mulf %150, %151 : vector<16x32xf32>
    %153 = vector.broadcast %128 : vector<1x32xf32> to vector<16x32xf32>
    %154 = arith.addf %152, %153 : vector<16x32xf32>
    %155 = arith.truncf %154 : vector<16x32xf32> to vector<16x32xbf16>
    %c1_57 = arith.constant 1 : index
    %c0_58 = arith.constant 0 : index
    %c0_59 = arith.constant 0 : index
    %156 = vector.load %arg5[%c1_57, %c0_58, %c0_59] : memref<2x32x96xbf16, #tpu.memory_space<vmem>>, vector<1x32x96xbf16>
    %157 = vector.shape_cast %156 : vector<1x32x96xbf16> to vector<32x96xbf16>
    %cst_60 = arith.constant dense<0.000000e+00> : vector<16x96xf32>
    %158 = tpu.matmul %155, %157, %cst_60 {dimension_numbers = #tpu.dot_dimension_numbers<[1], [0], [0], [1], [0, 0, 1, 1], [], []>} : vector<16x32xbf16>, vector<32x96xbf16>, vector<16x96xf32> -> vector<16x96xf32>
    %c1_61 = arith.constant 1 : index
    %c0_62 = arith.constant 0 : index
    %c0_63 = arith.constant 0 : index
    %159 = vector.load %arg6[%c1_61, %c0_62, %c0_63] : memref<2x1x96xf32, #tpu.memory_space<vmem>>, vector<1x1x96xf32>
    %160 = vector.shape_cast %159 : vector<1x1x96xf32> to vector<1x96xf32>
    %161 = vector.broadcast %160 : vector<1x96xf32> to vector<16x96xf32>
    %162 = arith.addf %158, %161 : vector<16x96xf32>
    %163 = vector.extract_strided_slice %162 {offsets = [0, 0], sizes = [16, 32], strides = [1, 1]} : vector<16x96xf32> to vector<16x32xf32>
    %cst_64 = arith.constant 0.353553385 : f32
    %164 = vector.broadcast %cst_64 : f32 to vector<16x32xf32>
    %165 = arith.mulf %163, %164 : vector<16x32xf32>
    %166 = vector.extract_strided_slice %162 {offsets = [0, 32], sizes = [16, 32], strides = [1, 1]} : vector<16x96xf32> to vector<16x32xf32>
    %167 = vector.extract_strided_slice %162 {offsets = [0, 64], sizes = [16, 32], strides = [1, 1]} : vector<16x96xf32> to vector<16x32xf32>
    %168 = vector.shape_cast %165 : vector<16x32xf32> to vector<16x4x8xf32>
    %169 = tpu.transpose %168, [1, 0, 2] : vector<16x4x8xf32> -> vector<4x16x8xf32>
    %170 = vector.shape_cast %166 : vector<16x32xf32> to vector<16x4x8xf32>
    %171 = tpu.transpose %170, [1, 0, 2] : vector<16x4x8xf32> -> vector<4x16x8xf32>
    %172 = vector.shape_cast %167 : vector<16x32xf32> to vector<16x4x8xf32>
    %173 = tpu.transpose %172, [1, 0, 2] : vector<16x4x8xf32> -> vector<4x16x8xf32>
    %174 = arith.truncf %169 : vector<4x16x8xf32> to vector<4x16x8xbf16>
    %175 = arith.truncf %171 : vector<4x16x8xf32> to vector<4x16x8xbf16>
    "tpu.trace_start"() <{level = 10 : i32, message = "ntd,nud->ntu"}> : () -> ()
    %cst_65 = arith.constant dense<0.000000e+00> : vector<4x16x16xf32>
    %176 = tpu.matmul %174, %175, %cst_65 {dimension_numbers = #tpu.dot_dimension_numbers<[2], [2], [1], [1], [0, 0, 0, 1, 1, 1], [0], [0]>} : vector<4x16x8xbf16>, vector<4x16x8xbf16>, vector<4x16x16xf32> -> vector<4x16x16xf32>
    "tpu.trace_stop"() : () -> ()
    %177 = vector.broadcast %9 : vector<1x16x16xf32> to vector<4x16x16xf32>
    %178 = arith.addf %176, %177 : vector<4x16x16xf32>
    %cst_66 = arith.constant dense<0xFF800000> : vector<4x16xf32>
    %179 = vector.multi_reduction <maximumf>, %178, %cst_66 [2] : vector<4x16x16xf32> to vector<4x16xf32>
    %180 = vector.shape_cast %179 : vector<4x16xf32> to vector<4x16x1xf32>
    %181 = vector.broadcast %180 : vector<4x16x1xf32> to vector<4x16x16xf32>
    %182 = arith.subf %178, %181 : vector<4x16x16xf32>
    %183 = math.exp %182 : vector<4x16x16xf32>
    %cst_67 = arith.constant dense<0.000000e+00> : vector<4x16xf32>
    %184 = vector.multi_reduction <add>, %183, %cst_67 [2] : vector<4x16x16xf32> to vector<4x16xf32>
    %185 = vector.shape_cast %184 : vector<4x16xf32> to vector<4x16x1xf32>
    %186 = tpu.reciprocal %185 {approx = true} : vector<4x16x1xf32> -> vector<4x16x1xf32>
    %187 = vector.broadcast %186 : vector<4x16x1xf32> to vector<4x16x16xf32>
    %188 = arith.mulf %183, %187 : vector<4x16x16xf32>
    %189 = arith.truncf %188 : vector<4x16x16xf32> to vector<4x16x16xbf16>
    %190 = arith.truncf %173 : vector<4x16x8xf32> to vector<4x16x8xbf16>
    "tpu.trace_start"() <{level = 10 : i32, message = "ntu,nud->ntd"}> : () -> ()
    %cst_68 = arith.constant dense<0.000000e+00> : vector<4x16x8xf32>
    %191 = tpu.matmul %189, %190, %cst_68 {dimension_numbers = #tpu.dot_dimension_numbers<[2], [1], [1], [2], [0, 0, 0, 1, 1, 2], [0], [0]>} : vector<4x16x16xbf16>, vector<4x16x8xbf16>, vector<4x16x8xf32> -> vector<4x16x8xf32>
    "tpu.trace_stop"() : () -> ()
    %192 = tpu.transpose %191, [1, 0, 2] : vector<4x16x8xf32> -> vector<16x4x8xf32>
    %193 = vector.shape_cast %192 : vector<16x4x8xf32> to vector<16x32xf32>
    %194 = arith.truncf %193 : vector<16x32xf32> to vector<16x32xbf16>
    %c1_69 = arith.constant 1 : index
    %c0_70 = arith.constant 0 : index
    %c0_71 = arith.constant 0 : index
    %195 = vector.load %arg7[%c1_69, %c0_70, %c0_71] : memref<2x32x32xbf16, #tpu.memory_space<vmem>>, vector<1x32x32xbf16>
    %196 = vector.shape_cast %195 : vector<1x32x32xbf16> to vector<32x32xbf16>
    %cst_72 = arith.constant dense<0.000000e+00> : vector<16x32xf32>
    %197 = tpu.matmul %194, %196, %cst_72 {dimension_numbers = #tpu.dot_dimension_numbers<[1], [0], [0], [1], [0, 0, 1, 1], [], []>} : vector<16x32xbf16>, vector<32x32xbf16>, vector<16x32xf32> -> vector<16x32xf32>
    %198 = vector.broadcast %131 : vector<1x32xf32> to vector<16x32xf32>
    %199 = arith.addf %197, %198 : vector<16x32xf32>
    %200 = arith.addf %124, %199 : vector<16x32xf32>
    %cst_73 = arith.constant dense<0.000000e+00> : vector<16xf32>
    %201 = vector.multi_reduction <add>, %200, %cst_73 [1] : vector<16x32xf32> to vector<16xf32>
    %202 = vector.shape_cast %201 : vector<16xf32> to vector<16x1xf32>
    %cst_74 = arith.constant 3.200000e+01 : f32
    %203 = vector.broadcast %cst_74 : f32 to vector<16x1xf32>
    %204 = arith.divf %202, %203 : vector<16x1xf32>
    %205 = vector.broadcast %204 : vector<16x1xf32> to vector<16x32xf32>
    %206 = arith.subf %200, %205 : vector<16x32xf32>
    %207 = arith.mulf %206, %206 : vector<16x32xf32>
    %cst_75 = arith.constant dense<0.000000e+00> : vector<16xf32>
    %208 = vector.multi_reduction <add>, %207, %cst_75 [1] : vector<16x32xf32> to vector<16xf32>
    %209 = vector.shape_cast %208 : vector<16xf32> to vector<16x1xf32>
    %cst_76 = arith.constant 3.200000e+01 : f32
    %210 = vector.broadcast %cst_76 : f32 to vector<16x1xf32>
    %211 = arith.divf %209, %210 : vector<16x1xf32>
    %212 = vector.broadcast %204 : vector<16x1xf32> to vector<16x32xf32>
    %213 = arith.subf %200, %212 : vector<16x32xf32>
    %cst_77 = arith.constant 9.99999974E-6 : f32
    %214 = vector.broadcast %cst_77 : f32 to vector<16x1xf32>
    %215 = arith.addf %211, %214 : vector<16x1xf32>
    %216 = math.rsqrt %215 : vector<16x1xf32>
    %217 = vector.broadcast %216 : vector<16x1xf32> to vector<16x32xf32>
    %218 = arith.mulf %213, %217 : vector<16x32xf32>
    %219 = vector.broadcast %129 : vector<1x32xf32> to vector<16x32xf32>
    %220 = arith.mulf %218, %219 : vector<16x32xf32>
    %221 = vector.broadcast %130 : vector<1x32xf32> to vector<16x32xf32>
    %222 = arith.addf %220, %221 : vector<16x32xf32>
    %223 = arith.truncf %222 : vector<16x32xf32> to vector<16x32xbf16>
    %c1_78 = arith.constant 1 : index
    %c0_79 = arith.constant 0 : index
    %c0_80 = arith.constant 0 : index
    %224 = vector.load %arg9[%c1_78, %c0_79, %c0_80] : memref<2x32x64xbf16, #tpu.memory_space<vmem>>, vector<1x32x64xbf16>
    %225 = vector.shape_cast %224 : vector<1x32x64xbf16> to vector<32x64xbf16>
    %cst_81 = arith.constant dense<0.000000e+00> : vector<16x64xf32>
    %226 = tpu.matmul %223, %225, %cst_81 {dimension_numbers = #tpu.dot_dimension_numbers<[1], [0], [0], [1], [0, 0, 1, 1], [], []>} : vector<16x32xbf16>, vector<32x64xbf16>, vector<16x64xf32> -> vector<16x64xf32>
    %c1_82 = arith.constant 1 : index
    %c0_83 = arith.constant 0 : index
    %c0_84 = arith.constant 0 : index
    %227 = vector.load %arg10[%c1_82, %c0_83, %c0_84] : memref<2x1x64xf32, #tpu.memory_space<vmem>>, vector<1x1x64xf32>
    %228 = vector.shape_cast %227 : vector<1x1x64xf32> to vector<1x64xf32>
    %229 = vector.broadcast %228 : vector<1x64xf32> to vector<16x64xf32>
    %230 = arith.addf %226, %229 : vector<16x64xf32>
    %cst_85 = arith.constant 0.000000e+00 : f32
    %231 = vector.broadcast %cst_85 : f32 to vector<16x64xf32>
    %232 = arith.maximumf %230, %231 : vector<16x64xf32>
    %233 = arith.truncf %232 : vector<16x64xf32> to vector<16x64xbf16>
    %c1_86 = arith.constant 1 : index
    %c0_87 = arith.constant 0 : index
    %c0_88 = arith.constant 0 : index
    %234 = vector.load %arg11[%c1_86, %c0_87, %c0_88] : memref<2x64x32xbf16, #tpu.memory_space<vmem>>, vector<1x64x32xbf16>
    %235 = vector.shape_cast %234 : vector<1x64x32xbf16> to vector<64x32xbf16>
    %cst_89 = arith.constant dense<0.000000e+00> : vector<16x32xf32>
    %236 = tpu.matmul %233, %235, %cst_89 {dimension_numbers = #tpu.dot_dimension_numbers<[1], [0], [0], [1], [0, 0, 1, 1], [], []>} : vector<16x64xbf16>, vector<64x32xbf16>, vector<16x32xf32> -> vector<16x32xf32>
    %237 = vector.broadcast %132 : vector<1x32xf32> to vector<16x32xf32>
    %238 = arith.addf %236, %237 : vector<16x32xf32>
    %239 = arith.addf %200, %238 : vector<16x32xf32>
    %c1_90 = arith.constant 1 : index
    %c0_91 = arith.constant 0 : index
    %240 = vector.load %arg4[%c1_90, %c0_91] : memref<3x32xf32, #tpu.memory_space<vmem>>, vector<1x32xf32>
    %c2 = arith.constant 2 : index
    %c0_92 = arith.constant 0 : index
    %241 = vector.load %arg4[%c2, %c0_92] : memref<3x32xf32, #tpu.memory_space<vmem>>, vector<1x32xf32>
    %cst_93 = arith.constant dense<0.000000e+00> : vector<16xf32>
    %242 = vector.multi_reduction <add>, %239, %cst_93 [1] : vector<16x32xf32> to vector<16xf32>
    %243 = vector.shape_cast %242 : vector<16xf32> to vector<16x1xf32>
    %cst_94 = arith.constant 3.200000e+01 : f32
    %244 = vector.broadcast %cst_94 : f32 to vector<16x1xf32>
    %245 = arith.divf %243, %244 : vector<16x1xf32>
    %246 = vector.broadcast %245 : vector<16x1xf32> to vector<16x32xf32>
    %247 = arith.subf %239, %246 : vector<16x32xf32>
    %248 = arith.mulf %247, %247 : vector<16x32xf32>
    %cst_95 = arith.constant dense<0.000000e+00> : vector<16xf32>
    %249 = vector.multi_reduction <add>, %248, %cst_95 [1] : vector<16x32xf32> to vector<16xf32>
    %250 = vector.shape_cast %249 : vector<16xf32> to vector<16x1xf32>
    %cst_96 = arith.constant 3.200000e+01 : f32
    %251 = vector.broadcast %cst_96 : f32 to vector<16x1xf32>
    %252 = arith.divf %250, %251 : vector<16x1xf32>
    %253 = vector.broadcast %245 : vector<16x1xf32> to vector<16x32xf32>
    %254 = arith.subf %239, %253 : vector<16x32xf32>
    %cst_97 = arith.constant 9.99999974E-6 : f32
    %255 = vector.broadcast %cst_97 : f32 to vector<16x1xf32>
    %256 = arith.addf %252, %255 : vector<16x1xf32>
    %257 = math.rsqrt %256 : vector<16x1xf32>
    %258 = vector.broadcast %257 : vector<16x1xf32> to vector<16x32xf32>
    %259 = arith.mulf %254, %258 : vector<16x32xf32>
    %260 = vector.broadcast %240 : vector<1x32xf32> to vector<16x32xf32>
    %261 = arith.mulf %259, %260 : vector<16x32xf32>
    %262 = vector.broadcast %241 : vector<1x32xf32> to vector<16x32xf32>
    %263 = arith.addf %261, %262 : vector<16x32xf32>
    %c0_98 = arith.constant 0 : index
    %c0_99 = arith.constant 0 : index
    %264 = vector.load %arg12[%c0_98, %c0_99] : memref<16x32xf32, #tpu.memory_space<vmem>>, vector<16x32xf32>
    tpu.vector_store %arg12[%c0_98, %c0_99], %263 {strides = array<i32>} : memref<16x32xf32, #tpu.memory_space<vmem>>, vector<16x32xf32>,
    return
  }
}

</mosaic_0001>

<bundles_post_ra>
// kernel: tpu_custom_call.1
= control target key start
LH: loop header
LB: loop body
LE: loop exit
PB: predicated region body
PF: predicated region fallthrough
CT: control target
= control target key end

     0   :  { %17 = vsyncpa [#allocation3], 0  ;;  %s6088_s0 = inlined_call_operand.hbm [shape: bf16[16,16], index: 0, kind: input, shape index: {}]   ;;  %s6089_s1 = inlined_call_operand.vmem [shape: f32[16,16], index: 1, kind: input, shape index: {}]   ;;  %s6090_s2 = inlined_call_operand.vmem [shape: f32[16,32], index: 2, kind: input, shape index: {}]   ;;  %s6091_s3 = inlined_call_operand.hbm [shape: bf16[16,32], index: 3, kind: input, shape index: {}]   ;;  %s6092_s4 = inlined_call_operand.hbm [shape: f32[3,32], index: 4, kind: input, shape index: {}]   ;;  %s6093_s5 = inlined_call_operand.vmem [shape: bf16[2,32,96], index: 5, kind: input, shape index: {}]   ;;  %s6094_s6 = inlined_call_operand.hbm [shape: f32[2,1,96], index: 6, kind: input, shape index: {}]   ;;  %s6095_s7 = inlined_call_operand.vmem [shape: bf16[2,32,32], index: 7, kind: input, shape index: {}]   ;;  %s6096_s8 = inlined_call_operand.vmem [shape: f32[2,6,32], index: 8, kind: input, shape index: {}]   ;;  %s6097_s9 = inlined_call_operand.vmem [shape: bf16[2,32,64], index: 9, kind: input, shape index: {}]   ;;  %s6098_s10 = inlined_call_operand.hbm [shape: f32[2,1,64], index: 10, kind: input, shape index: {}]   ;;  %s6099_s11 = inlined_call_operand.vmem [shape: bf16[2,64,32], index: 11, kind: input, shape index: {}]   ;;  %s6100_s12 = inlined_call_operand.hbm [shape: f32[16,32], index: 12, kind: output, shape index: {}]  }
   0x1   :  { %18 = vsyncpa [#allocation6], 0 }
   0x2   :  { %19 = vsyncpa [#allocation9], 0 }
   0x3   :  { %20 = vsyncpa [#allocation4], 0  ;;  %s4967_s21 = smov [#allocation5]   ;;  %s4968_s23 = smov [#allocation8]  }
   0x4   :  { %s42_s22 = sshll.u32 %s4967_s21, 4  ;;  %s66_s24 = sshll.u32 %s4968_s23, 4  ;;  %s43_s22 = int_to_ptr.vmem [resolvable:$true] %s42_s22  ;;  %s5053_s24 = int_to_ptr.vmem [resolvable:$true] %s66_s24 }
   0x5   :  { %s4827_s27 = scalar_lea.hbm %s6091_s3, 128 }
   0x6   :  { %p4828_p0 = scmp.ne.s32.totalorder %s6091_s3, %s4827_s27  ;;  %p4831_p1 = scmp.lt.u32.totalorder %s4827_s27, %s6091_s3 }
   0x8   :  { %p4833_p2 = pnand %p4831_p1, %p4828_p0 }
   0xa   :  { %4836 = shalt.err (!%p4833_p2)
}
   0xb   :  { %s4837_s14 = scalar_lea.vmem %s43_s22, 128  ;;  %p4842_p4 = scmp.lt.s32.totalorder %s43_s22, %s43_s22 }
   0xc   :  { %p4838_p3 = scmp.ne.s32.totalorder %s43_s22, %s4837_s14  ;;  %p4843_p5 = scmp.lt.s32.totalorder %s4837_s14, %s4837_s14 }
   0xe   :  { %p4844_p6 = por %p4843_p5, %p4842_p4 }
  0x10   :  { %p4845_p7 = pnand %p4844_p6, %p4838_p3 }
  0x12   :  { %4848 = shalt.err (!%p4845_p7)
}
  0x13   :  { %s4969_s15 = smov 64   ;;  %s4970_s16 = smov 4  }
  0x14   :  { %48 = dma.hbm_to_vmem [thread:$0]  %s6091_s3, 128, %s43_s22, [#allocation6], %s4969_s15, %s4969_s15, %s4970_s16  }
  0x15   :  { %s4849_s21 = scalar_lea.hbm %s6094_s6, 32 }
  0x16   :  { %p4850_p8 = scmp.ne.s32.totalorder %s6094_s6, %s4849_s21  ;;  %p4853_p9 = scmp.lt.u32.totalorder %s4849_s21, %s6094_s6 }
  0x18   :  { %p4855_p10 = pnand %p4853_p9, %p4850_p8 }
  0x1a   :  { %4858 = shalt.err (!%p4855_p10)
}
  0x1b   :  { %s4859_s28 = scalar_lea.vmem %s5053_s24, 32  ;;  %p4864_p12 = scmp.lt.s32.totalorder %s5053_s24, %s5053_s24 }
  0x1c   :  { %p4860_p11 = scmp.ne.s32.totalorder %s5053_s24, %s4859_s28  ;;  %p4865_p13 = scmp.lt.s32.totalorder %s4859_s28, %s4859_s28 }
  0x1e   :  { %p4866_p0 = por %p4865_p13, %p4864_p12 }
  0x20   :  { %p4867_p1 = pnand %p4866_p0, %p4860_p11 }
  0x22   :  { %4870 = shalt.err (!%p4867_p1)
}
  0x23   :  { %s4971_s3 = smov 16   ;;  %s4972_s22 = smov 1  }
  0x24   :  { %72 = dma.hbm_to_vmem [thread:$0]  %s6094_s6, 32, %s5053_s24, [#allocation9], %s4971_s3, %s4971_s3, %s4972_s22  }
  0x25   :  { %s4973_s13 = smov [#allocation2]   ;;  %s4974_s17 = smov [#allocation7]  }
  0x26   :  { %s26_s14 = sshll.u32 %s4973_s13, 4  ;;  %s55_s18 = sshll.u32 %s4974_s17, 4  ;;  %s27_s14 = int_to_ptr.vmem [resolvable:$true] %s26_s14  ;;  %s56_s18 = int_to_ptr.vmem [resolvable:$true] %s55_s18 }
  0x27   :  { %s4871_s21 = scalar_lea.hbm %s6088_s0, 128 }
  0x28   :  { %p4872_p2 = scmp.ne.s32.totalorder %s6088_s0, %s4871_s21  ;;  %p4875_p3 = scmp.lt.u32.totalorder %s4871_s21, %s6088_s0 }
  0x2a   :  { %p4877_p4 = pnand %p4875_p3, %p4872_p2 }
  0x2c   :  { %4880 = shalt.err (!%p4877_p4)
}
  0x2d   :  { %s4881_s6 = scalar_lea.vmem %s27_s14, 128  ;;  %p4886_p6 = scmp.lt.s32.totalorder %s27_s14, %s27_s14 }
  0x2e   :  { %p4882_p5 = scmp.ne.s32.totalorder %s27_s14, %s4881_s6  ;;  %p4887_p7 = scmp.lt.s32.totalorder %s4881_s6, %s4881_s6 }
  0x30   :  { %p4888_p8 = por %p4887_p7, %p4886_p6 }
  0x32   :  { %p4889_p9 = pnand %p4888_p8, %p4882_p5 }
  0x34   :  { %4892 = shalt.err (!%p4889_p9)
}
  0x35   :  { %32 = dma.hbm_to_vmem [thread:$0]  %s6088_s0, 128, %s27_s14, [#allocation3], %s4969_s15, %s4969_s15, %s4970_s16  }
  0x36   :  { %s4893_s13 = scalar_lea.hbm %s6092_s4, 64 }
  0x37   :  { %p4894_p10 = scmp.ne.s32.totalorder %s6092_s4, %s4893_s13  ;;  %p4897_p11 = scmp.lt.u32.totalorder %s4893_s13, %s6092_s4 }
  0x39   :  { %p4899_p12 = pnand %p4897_p11, %p4894_p10 }
  0x3b   :  { %4902 = shalt.err (!%p4899_p12)
}
  0x3c   :  { %s4903_s23 = scalar_lea.vmem %s56_s18, 64  ;;  %p4908_p0 = scmp.lt.s32.totalorder %s56_s18, %s56_s18 }
  0x3d   :  { %p4904_p13 = scmp.ne.s32.totalorder %s56_s18, %s4903_s23  ;;  %p4909_p1 = scmp.lt.s32.totalorder %s4903_s23, %s4903_s23 }
  0x3f   :  { %p4910_p2 = por %p4909_p1, %p4908_p0 }
  0x41   :  { %p4911_p3 = pnand %p4910_p2, %p4904_p13 }
  0x43   :  { %4914 = shalt.err (!%p4911_p3)
}
  0x44   :  { %58 = dma.hbm_to_vmem [thread:$0]  %s6092_s4, 64, %s56_s18, [#allocation6]  }
  0x45   :  { %s4975_s14 = smov [#allocation10]   ;;  %s4915_s6 = scalar_lea.hbm %s6098_s10, 32 }
  0x46   :  { %s84_s25 = sshll.u32 %s4975_s14, 4  ;;  %p4916_p4 = scmp.ne.s32.totalorder %s6098_s10, %s4915_s6  ;;  %s85_s25 = int_to_ptr.vmem [resolvable:$true] %s84_s25 }
  0x47   :  { %p4919_p5 = scmp.lt.u32.totalorder %s4915_s6, %s6098_s10 }
  0x49   :  { %p4921_p6 = pnand %p4919_p5, %p4916_p4 }
  0x4b   :  { %4924 = shalt.err (!%p4921_p6)
}
  0x4c   :  { %s4925_s13 = scalar_lea.vmem %s85_s25, 32  ;;  %p4930_p8 = scmp.lt.s32.totalorder %s85_s25, %s85_s25 }
  0x4d   :  { %p4926_p7 = scmp.ne.s32.totalorder %s85_s25, %s4925_s13  ;;  %p4931_p9 = scmp.lt.s32.totalorder %s4925_s13, %s4925_s13 }
  0x4f   :  { %p4932_p10 = por %p4931_p9, %p4930_p8 }
  0x51   :  { %p4933_p11 = pnand %p4932_p10, %p4926_p7 }
  0x53   :  { %4936 = shalt.err (!%p4933_p11)
}
  0x54   :  { %90 = dma.hbm_to_vmem [thread:$0]  %s6098_s10, 32, %s85_s25, [#allocation9], %s4971_s3, %s4971_s3, %s4972_s22  }
  0x55   :  { %4959 = dma.done.wait [#allocation3], 128  }
  0x56   :  { %4960 = vsyncadd [#allocation3], 4294967168 }
  0x57   :  { %4961 = dma.done.wait [#allocation6], 192  }
  0x58   :  { %4962 = vsyncadd [#allocation6], 4294967104 }
  0x59   :  { %4963 = dma.done.wait [#allocation9], 64  }
  0x5a   :  { %4964 = vsyncadd [#allocation9], 4294967232  ;;  %v4976_v0 = vmov 0.0   ;;  %vm4977_vm0 = vmmov 0   ;;  %v4717_v1 = vld [vmem:[#allocation5] sm:$0xff]   ;;  %v4718_v2 = vld [vmem:[#allocation2] sm:$0xff]   ;;  %v209_v31 = vlaneseq }
  0x5b   :  { %4492 = vmatprep.subr.bf16.mxu0 %v4976_v0  ;;  %4494 = vmatprep.mubr.msk.bf16.mxu0 %vm4977_vm0, %v4976_v0  ;;  %vm129_vm1 = vcmask 130048   ;;  %v4323_v3 = vld [vmem:[#allocation7] ss:$0 sm:$0xff]  ;;  %v174_v5 = vld [vmem:[%s6090_s2] sm:$0xff]  ;;  %v175_v9 = vld [vmem:[%s6090_s2 + $0x8] sm:$0xff]  ;;  %vm181_vm2 = vcmask 261120  }
  0x5c   :  { %4512 = vmatprep.subr.bf16.mxu1 %v4976_v0  ;;  %4514 = vmatprep.mubr.msk.bf16.mxu1 %vm4977_vm0, %v4976_v0  ;;  %v4719_v26 = vld [vmem:[%s6093_s5] sm:$0xff]   ;;  %v4720_v27 = vld [vmem:[%s6093_s5 + $0x8] sm:$0xff]   ;;  %v5168_v35 = vshrl.u32 %v209_v31, 7  ;;  %v4327_v50 = vld [vmem:[#allocation8] ss:$0 sm:$0xff]  ;;  %s4978_s14 = smov 112  }
  0x5d   :  { %4493 = vmatpush3.bf16.msra.mxu0 %v4717_v1  ;;  %v180_v37 = vld [vmem:[%s6096_s8] sm:$0x3f]  ;;  %s4979_s25 = smov 120   ;;  %s4980_s26 = smov 104   ;;  %vm1197_vm3 = vcmask 64512   ;;  %vm1958_vm4 = vcmask 195584  }
  0x5e   :  { %4498 = vmatprep.subr.bf16.mxu0 %v4976_v0  ;;  %v211_v36 = vsub.s32 0, %v5168_v35  ;;  %v217_v41 = vsub.s32 1, %v5168_v35  ;;  %s4981_s27 = smov 96   ;;  %s4984_s10 = smov 8   ;;  %vm2173_vm5 = vcmask 523264  }
  0x5f   :  { %s4985_s22 = smov 24  }
  0x60   :  { %4495 = vmatmul.mubr.msk.bf16.vlgmr.msra.gmra.mrb[0].mxu0 %vm129_vm1, %v4718_v2  ;;  %v212_v39 = vrot.slane %v180_v37, %v211_v36  ;;  %v218_v45 = vrot.slane %v180_v37, %v217_v41 }
  0x61   :  { %4502 = vmatprep.mubr.msk.bf16.mxu0 %vm4977_vm0, %v4976_v0  ;;  %4499 = vmatpush3.bf16.msra.mxu0 %v4719_v26 }
  0x62   :  { %4500 = vmatprep.subr.bf16.mxu0 %v4976_v0 }
  0x65   :  { %4501 = vmatpush3.bf16.msra.mxu0 %v4720_v27 }
  0x66   :  { %4506 = vmatprep.subr.bf16.mxu0 %v4976_v0 }
 0x133   :  { %v167_v4 = vpop.f32.mrb[0].mxu0 }
 0x134   :  { %v168_v6 = vadd.f32 %v4323_v3, %v167_v4  ;;  %v4496_v7 = vpop.f32.mrb[1].mxu0 }
 0x135   :  { %v170_v8 = vpop.f32.mrb[2].mxu0 }
 0x136   :  { %v5148_v10 = vadd.f32 %v174_v5, %v168_v6  ;;  %v171_v11 = vadd.f32 %v4323_v3, %v170_v8  ;;  %v4497_v12 = vpop.f32.mrb[3].mxu0  ;;  %v4982_v5 = vmov 1983009808  }
 0x137   :  { %v314_v6 = vunpack.c.l.s4 %v4982_v5 }
 0x138   :  { %v5150_v13 = vadd.f32 %v175_v9, %v171_v11  ;;  %v182_v14 = vsel %vm181_vm2, %v5148_v10, 0.0  ;;  %v4983_v9 = vmov 1934713408  }
 0x139   :  { %183 = vadd.xlane.f32.xlu0 %v182_v14  ;;  %v346_v11 = vunpack.c.l.s4 %v4983_v9  ;;  %v315_v12 = vunpack.c.0.s8 %v314_v6 }
 0x13a   :  { %v185_v15 = vsel %vm181_vm2, %v5150_v13, 0.0 }
 0x13d   :  { %186 = vadd.xlane.f32.xlu0 %v185_v15 }
 0x1c6   :  { %v184_v16 = vpop.xlane.xlu0 %183 }
 0x1c7   :  { %v189_v17 = vmul.f32 0.03125, %v184_v16  ;;  %v347_v16 = vunpack.c.0.s8 %v346_v11 }
 0x1c9   :  { %v191_v18 = vsub.f32 %v5148_v10, %v189_v17  ;;  %v5249_v17 = vsub.s32 %v315_v12, %v5168_v35 }
 0x1ca   :  { %v187_v19 = vpop.xlane.xlu0 %186 }
 0x1cb   :  { %v190_v20 = vmul.f32 0.03125, %v187_v19  ;;  %v193_v21 = vmul.f32 %v191_v18, %v191_v18 }
 0x1cd   :  { %v192_v22 = vsub.f32 %v5150_v13, %v190_v20  ;;  %v195_v23 = vsel %vm181_vm2, %v193_v21, 0.0 }
 0x1ce   :  { %196 = vadd.xlane.f32.xlu1 %v195_v23 }
 0x1cf   :  { %v194_v24 = vmul.f32 %v192_v22, %v192_v22 }
 0x1d1   :  { %v198_v25 = vsel %vm181_vm2, %v194_v24, 0.0  ;;  %v5252_v24 = vsub.s32 %v347_v16, %v5168_v35 }
 0x1d2   :  { %199 = vadd.xlane.f32.xlu1 %v198_v25 }
 0x25b   :  { %v197_v28 = vpop.xlane.xlu1 %196 }
 0x25c   :  { %v201_v29 = vmul.f32 0.03125, %v197_v28 }
 0x25e   :  { %v203_v30 = vadd.f32 1e-05, %v201_v29 }
 0x25f   :  { %v200_v32 = vpop.xlane.xlu1 %199 }
 0x260   :  { %4739 = vrsqrt.f32 %v203_v30  ;;  %v202_v33 = vmul.f32 0.03125, %v200_v32 }
 0x262   :  { %v204_v34 = vadd.f32 1e-05, %v202_v33 }
 0x264   :  { %4741 = vrsqrt.f32 %v204_v34 }
 0x26a   :  { %v4740_v38 = vpop.eup %4739 }
 0x26b   :  { %v207_v40 = vmul.f32 %v4740_v38, %v191_v18 }
 0x26d   :  { %v213_v43 = vmul.f32 %v212_v39, %v207_v40 }
 0x26e   :  { %v4742_v42 = vpop.eup %4741 }
 0x26f   :  { %v208_v44 = vmul.f32 %v4742_v42, %v192_v22  ;;  %v219_v47 = vadd.f32 %v218_v45, %v213_v43 }
 0x271   :  { %v214_v46 = vmul.f32 %v212_v39, %v208_v44 }
 0x273   :  { %v220_v48 = vadd.f32 %v218_v45, %v214_v46 }
 0x275   :  { %v221_v49 = vpack.c.bf16 %v220_v48, %v219_v47 }
 0x277   :  { %4503 = vmatmul.mubr.msk.bf16.vlgmr.msra.gmra.mrb[4].mxu0 %vm181_vm2, %v221_v49 }
 0x278   :  { %4508 = vmatprep.mubr.msk.bf16.mxu0 %vm4977_vm0, %v4976_v0 }
 0x34a   :  { %v282_v51 = vpop.f32.mrb[4].mxu0 }
 0x34b   :  { %v5182_v52 = vadd.f32 %v4327_v50, %v282_v51  ;;  %v4504_v53 = vpop.f32.mrb[5].mxu0 }
 0x34c   :  { %v285_v54 = vpop.f32.mrb[6].mxu0 }
 0x34d   :  { %589 = vrot.lane.b32.xlu1 %v5182_v52, %s4978_s14  ;;  %585 = vrot.lane.b32.xlu0 %v5182_v52, %s4979_s25  ;;  %v4505_v55 = vpop.f32.mrb[7].mxu0  ;;  %v5188_v56 = vadd.f32 %v4327_v50, %v285_v54  ;;  %v5199_v57 = vmul.f32 0.35355338, %v5182_v52 }
 0x34f   :  { %v5208_v58 = vmul.f32 0.35355338, %v5188_v56 }
 0x351   :  { %593 = vrot.lane.b32.xlu0 %v5182_v52, %s4980_s26  ;;  %587 = vrot.lane.b32.xlu1 %v5188_v56, %s4979_s25 }
 0x355   :  { %597 = vrot.lane.b32.xlu0 %v5182_v52, %s4981_s27  ;;  %591 = vrot.lane.b32.xlu1 %v5188_v56, %s4978_s14 }
 0x359   :  { %293 = vrot.lane.b32.xlu0 %v5199_v57, %s4979_s25  ;;  %595 = vrot.lane.b32.xlu1 %v5188_v56, %s4980_s26 }
 0x35d   :  { %599 = vrot.lane.b32.xlu1 %v5188_v56, %s4981_s27 }
 0x361   :  { %295 = vrot.lane.b32.xlu1 %v5208_v58, %s4979_s25 }
 0x3bf   :  { %v5212_v59 = vpop.permute.xlu1 %589  ;;  %v5214_v60 = vpop.permute.xlu0 %585 }
 0x3c0   :  { %601 = vrot.lane.b32.xlu0 %v5214_v60, %s4981_s27 }
 0x3c3   :  { %v5218_v61 = vpop.permute.xlu1 %587  ;;  %v5224_v62 = vpop.permute.xlu0 %593 }
 0x3c4   :  { %605 = vrot.lane.b32.xlu0 %v5212_v59, %s4981_s27  ;;  %603 = vrot.lane.b32.xlu1 %v5218_v61, %s4981_s27 }
 0x3c7   :  { %v5226_v63 = vpop.permute.xlu1 %591  ;;  %v598_v2 = vpop.permute.xlu0 %597 }
 0x3c8   :  { %609 = vrot.lane.b32.xlu0 %v5224_v62, %s4981_s27  ;;  %607 = vrot.lane.b32.xlu1 %v5226_v63, %s4981_s27 }
 0x3cb   :  { %v5232_v1 = vpop.permute.xlu1 %595  ;;  %v5244_v4 = vpop.permute.xlu0 %293 }
 0x3cc   :  { %299 = vrot.lane.b32.xlu0 %v5199_v57, %s4978_s14  ;;  %611 = vrot.lane.b32.xlu1 %v5232_v1, %s4981_s27 }
 0x3cf   :  { %v600_v3 = vpop.permute.xlu1 %599 }
 0x3d0   :  { %305 = vrot.lane.b32.xlu0 %v5199_v57, %s4980_s26  ;;  %301 = vrot.lane.b32.xlu1 %v5208_v58, %s4978_s14 }
 0x3d3   :  { %v5246_v7 = vpop.permute.xlu1 %295 }
 0x3d4   :  { %307 = vrot.lane.b32.xlu1 %v5208_v58, %s4980_s26 }
 0x432   :  { %v602_v8 = vpop.permute.xlu0 %601 }
 0x436   :  { %v606_v14 = vpop.permute.xlu0 %605  ;;  %v604_v15 = vpop.permute.xlu1 %603 }
 0x437   :  { %v621_v18 = vcombine.low %v598_v2, %v606_v14  ;;  %v622_v19 = vcombine.high %v598_v2, %v606_v14 }
 0x439   :  { %v629_v25 = vrot.slane %v621_v18, %v5249_v17  ;;  %v636_v26 = vrot.slane %v622_v19, %v5249_v17 }
 0x43a   :  { %v610_v20 = vpop.permute.xlu0 %609  ;;  %v608_v21 = vpop.permute.xlu1 %607 }
 0x43b   :  { %v637_v22 = vcombine.low %v602_v8, %v610_v20  ;;  %v638_v23 = vcombine.high %v602_v8, %v610_v20  ;;  %v689_v29 = vcombine.low %v600_v3, %v608_v21  ;;  %v690_v30 = vcombine.high %v600_v3, %v608_v21 }
 0x43d   :  { %v645_v27 = vrot.slane %v637_v22, %v5249_v17  ;;  %v652_v28 = vrot.slane %v638_v23, %v5249_v17  ;;  %v697_v46 = vrot.slane %v689_v29, %v5249_v17  ;;  %v704_v47 = vrot.slane %v690_v30, %v5249_v17 }
 0x43e   :  { %v300_v31 = vpop.permute.xlu0 %299  ;;  %v612_v32 = vpop.permute.xlu1 %611 }
 0x43f   :  { %v653_v33 = vcombine.low %v629_v25, %v645_v27  ;;  %v654_v34 = vcombine.high %v629_v25, %v645_v27  ;;  %v669_v37 = vcombine.low %v636_v26, %v652_v28  ;;  %v670_v38 = vcombine.high %v636_v26, %v652_v28 }
 0x440   :  { %v705_v39 = vcombine.low %v604_v15, %v612_v32  ;;  %v706_v40 = vcombine.high %v604_v15, %v612_v32  ;;  %v311_v53 = vcombine.low %v5199_v57, %v300_v31  ;;  %v312_v54 = vcombine.high %v5199_v57, %v300_v31 }
 0x441   :  { %v661_v42 = vrot.slane %v653_v33, %v5252_v24  ;;  %v668_v43 = vrot.slane %v654_v34, %v5252_v24  ;;  %v677_v44 = vrot.slane %v669_v37, %v5252_v24  ;;  %v684_v45 = vrot.slane %v670_v38, %v5252_v24 }
 0x442   :  { %v713_v48 = vrot.slane %v705_v39, %v5249_v17  ;;  %v720_v49 = vrot.slane %v706_v40, %v5249_v17  ;;  %v302_v55 = vpop.permute.xlu1 %301  ;;  %v306_v8 = vpop.permute.xlu0 %305  ;;  %v319_v18 = vrot.slane %v311_v53, %v5249_v17  ;;  %v326_v57 = vrot.slane %v312_v54, %v5249_v17 }
 0x443   :  { %v757_v50 = vcombine.low %v661_v42, %v668_v43  ;;  %v4335_v51 = vcombine.high %v661_v42, %v668_v43  ;;  %v773_v9 = vcombine.low %v677_v44, %v684_v45  ;;  %v4336_v11 = vcombine.high %v677_v44, %v684_v45 }
 0x444   :  { %v721_v2 = vcombine.low %v697_v46, %v713_v48  ;;  %v722_v3 = vcombine.high %v697_v46, %v713_v48  ;;  %v737_v5 = vcombine.low %v704_v47, %v720_v49  ;;  %v738_v6 = vcombine.high %v704_v47, %v720_v49 }
 0x445   :  { %v327_v19 = vcombine.low %v5244_v4, %v306_v8  ;;  %v328_v20 = vcombine.high %v5244_v4, %v306_v8  ;;  %v5277_v21 = vrot.slane %v757_v50, %v5249_v17  ;;  %v5280_v22 = vrot.slane %v4335_v51, %v5249_v17 }
 0x446   :  { %v729_v12 = vrot.slane %v721_v2, %v5252_v24  ;;  %v736_v14 = vrot.slane %v722_v3, %v5252_v24  ;;  %v745_v15 = vrot.slane %v737_v5, %v5252_v24  ;;  %v752_v16 = vrot.slane %v738_v6, %v5252_v24  ;;  %v308_v29 = vpop.permute.xlu1 %307 }
 0x447   :  { %v379_v23 = vcombine.low %v5208_v58, %v302_v55  ;;  %v380_v25 = vcombine.high %v5208_v58, %v302_v55  ;;  %v5285_v26 = vrot.slane %v773_v9, %v5249_v17  ;;  %v5288_v27 = vrot.slane %v4336_v11, %v5249_v17 }
 0x448   :  { %v335_v28 = vrot.slane %v327_v19, %v5249_v17  ;;  %v342_v4 = vrot.slane %v328_v20, %v5249_v17  ;;  %v825_v30 = vcombine.low %v729_v12, %v736_v14  ;;  %v4337_v31 = vcombine.high %v729_v12, %v736_v14 }
 0x449   :  { %v841_v32 = vcombine.low %v745_v15, %v752_v16  ;;  %v4338_v33 = vcombine.high %v745_v15, %v752_v16  ;;  %v387_v58 = vrot.slane %v379_v23, %v5249_v17  ;;  %v394_v40 = vrot.slane %v380_v25, %v5249_v17 }
 0x44a   :  { %v343_v34 = vcombine.low %v319_v18, %v335_v28  ;;  %v344_v37 = vcombine.high %v319_v18, %v335_v28  ;;  %v359_v38 = vcombine.low %v326_v57, %v342_v4  ;;  %v360_v39 = vcombine.high %v326_v57, %v342_v4 }
 0x44b   :  { %v395_v42 = vcombine.low %v5246_v7, %v308_v29  ;;  %v396_v43 = vcombine.high %v5246_v7, %v308_v29  ;;  %v832_v48 = vrot.slane %v825_v30, %v5249_v17  ;;  %v840_v49 = vrot.slane %v4337_v31, %v5249_v17 }
 0x44c   :  { %v351_v44 = vrot.slane %v343_v34, %v5252_v24  ;;  %v358_v45 = vrot.slane %v344_v37, %v5252_v24  ;;  %v367_v46 = vrot.slane %v359_v38, %v5252_v24  ;;  %v374_v47 = vrot.slane %v360_v39, %v5252_v24 }
 0x44d   :  { %v403_v50 = vrot.slane %v395_v42, %v5249_v17  ;;  %v410_v51 = vrot.slane %v396_v43, %v5249_v17  ;;  %v848_v8 = vrot.slane %v841_v32, %v5249_v17  ;;  %v856_v9 = vrot.slane %v4338_v33, %v5249_v17 }
 0x44e   :  { %v447_v53 = vcombine.low %v351_v44, %v358_v45  ;;  %v4331_v54 = vcombine.high %v351_v44, %v358_v45  ;;  %v463_v55 = vcombine.low %v367_v46, %v374_v47  ;;  %v4332_v7 = vcombine.high %v367_v46, %v374_v47 }
 0x44f   :  { %v411_v2 = vcombine.low %v387_v58, %v403_v50  ;;  %v412_v3 = vcombine.high %v387_v58, %v403_v50  ;;  %v427_v5 = vcombine.low %v394_v40, %v410_v51  ;;  %v428_v6 = vcombine.high %v394_v40, %v410_v51 }
 0x450   :  { %v789_v11 = vcombine.low %v5277_v21, %v5280_v22  ;;  %v805_v12 = vcombine.low %v5285_v26, %v5288_v27  ;;  %v5315_v57 = vrot.slane %v447_v53, %v5249_v17  ;;  %v5318_v19 = vrot.slane %v4331_v54, %v5249_v17 }
 0x451   :  { %v419_v14 = vrot.slane %v411_v2, %v5252_v24  ;;  %v426_v15 = vrot.slane %v412_v3, %v5252_v24  ;;  %v435_v16 = vrot.slane %v427_v5, %v5252_v24  ;;  %v442_v18 = vrot.slane %v428_v6, %v5252_v24 }
 0x452   :  { %v5321_v20 = vrot.slane %v463_v55, %v5249_v17  ;;  %v5324_v23 = vrot.slane %v4332_v7, %v5249_v17  ;;  %v797_v30 = vrot.slane %v789_v11, %v5252_v24  ;;  %v813_v31 = vrot.slane %v805_v12, %v5252_v24 }
 0x453   :  { %v515_v25 = vcombine.low %v419_v14, %v426_v15  ;;  %v4333_v28 = vcombine.high %v419_v14, %v426_v15  ;;  %v531_v4 = vcombine.low %v435_v16, %v442_v18  ;;  %v4334_v29 = vcombine.high %v435_v16, %v442_v18 }
 0x454   :  { %v857_v38 = vcombine.low %v832_v48, %v840_v49  ;;  %v873_v39 = vcombine.low %v848_v8, %v856_v9  ;;  %v479_v58 = vcombine.low %v5315_v57, %v5318_v19  ;;  %v495_v40 = vcombine.low %v5321_v20, %v5324_v23 }
 0x455   :  { %v522_v32 = vrot.slane %v515_v25, %v5249_v17  ;;  %v530_v33 = vrot.slane %v4333_v28, %v5249_v17  ;;  %v538_v34 = vrot.slane %v531_v4, %v5249_v17  ;;  %v546_v37 = vrot.slane %v4334_v29, %v5249_v17 }
 0x456   :  { %v865_v44 = vrot.slane %v857_v38, %v5252_v24  ;;  %v881_v45 = vrot.slane %v873_v39, %v5252_v24  ;;  %v821_v50 = vcombine.low %v797_v30, %v813_v31  ;;  %v822_v51 = vcombine.high %v797_v30, %v813_v31 }
 0x457   :  { %v547_v42 = vcombine.low %v522_v32, %v530_v33  ;;  %v563_v43 = vcombine.low %v538_v34, %v546_v37  ;;  %v790_v55 = vcombine.high %v5277_v21, %v5280_v22  ;;  %v806_v7 = vcombine.high %v5285_v26, %v5288_v27 }
 0x458   :  { %v889_v53 = vcombine.low %v865_v44, %v881_v45  ;;  %v890_v54 = vcombine.high %v865_v44, %v881_v45  ;;  %v487_v2 = vrot.slane %v479_v58, %v5252_v24  ;;  %v503_v3 = vrot.slane %v495_v40, %v5252_v24 }
 0x459   :  { %v555_v46 = vrot.slane %v547_v42, %v5252_v24  ;;  %v571_v47 = vrot.slane %v563_v43, %v5252_v24  ;;  %v858_v5 = vcombine.high %v832_v48, %v840_v49  ;;  %v874_v6 = vcombine.high %v848_v8, %v856_v9 }
 0x45a   :  { %v1193_v11 = vpack.c.bf16 %v889_v53, %v821_v50  ;;  %v1194_v12 = vpack.c.bf16 %v890_v54, %v822_v51  ;;  %v804_v14 = vrot.slane %v790_v55, %v5252_v24  ;;  %v820_v15 = vrot.slane %v806_v7, %v5252_v24  ;;  %v179_v51 = vld [vmem:[%s6089_s1 + $0x8] sm:$0xff] }
 0x45b   :  { %v548_v16 = vcombine.high %v522_v32, %v530_v33  ;;  %v564_v18 = vcombine.high %v538_v34, %v546_v37  ;;  %v872_v25 = vrot.slane %v858_v5, %v5252_v24  ;;  %v888_v21 = vrot.slane %v874_v6, %v5252_v24 }
 0x45c   :  { %v1202_v22 = vsel %vm1197_vm3, %v1193_v11, 0  ;;  %v1249_v26 = vsel %vm1197_vm3, %v1194_v12, 0  ;;  %v579_v27 = vcombine.low %v555_v46, %v571_v47  ;;  %v580_v28 = vcombine.high %v555_v46, %v571_v47  ;;  %v178_v46 = vld [vmem:[%s6089_s1] sm:$0xff] }
 0x45d   :  { %4507 = vmatpush3.bf16.xpose.msra.mxu0 %v1202_v22  ;;  %4513 = vmatpush3.bf16.xpose.msra.mxu1 %v1249_v26  ;;  %v511_v48 = vcombine.low %v487_v2, %v503_v3  ;;  %v891_v49 = vcombine.low %v872_v25, %v888_v21  ;;  %v892_v8 = vcombine.high %v872_v25, %v888_v21 }
 0x45e   :  { %v512_v9 = vcombine.high %v487_v2, %v503_v3  ;;  %4518 = vmatprep.subr.bf16.mxu0 %v4976_v0  ;;  %4524 = vmatprep.subr.bf16.mxu1 %v4976_v0  ;;  %v823_v4 = vcombine.low %v804_v14, %v820_v15  ;;  %v824_v29 = vcombine.high %v804_v14, %v820_v15 }
 0x45f   :  { %v480_v30 = vcombine.high %v5315_v57, %v5318_v19  ;;  %v496_v31 = vcombine.high %v5321_v20, %v5324_v23  ;;  %v1189_v32 = vpack.c.bf16 %v579_v27, %v511_v48  ;;  %v562_v38 = vrot.slane %v548_v16, %v5252_v24 }
 0x460   :  { %v1190_v33 = vpack.c.bf16 %v580_v28, %v512_v9  ;;  %v1195_v34 = vpack.c.bf16 %v891_v49, %v823_v4  ;;  %v1196_v37 = vpack.c.bf16 %v892_v8, %v824_v29  ;;  %v578_v39 = vrot.slane %v564_v18, %v5252_v24 }
 0x461   :  { %v494_v58 = vrot.slane %v480_v30, %v5252_v24  ;;  %v510_v40 = vrot.slane %v496_v31, %v5252_v24 }
 0x462   :  { %v1296_v57 = vsel %vm1197_vm3, %v1195_v34, 0  ;;  %v1343_v19 = vsel %vm1197_vm3, %v1196_v37, 0  ;;  %v581_v20 = vcombine.low %v562_v38, %v578_v39  ;;  %v582_v23 = vcombine.high %v562_v38, %v578_v39 }
 0x463   :  { %v513_v42 = vcombine.low %v494_v58, %v510_v40  ;;  %v514_v43 = vcombine.high %v494_v58, %v510_v40 }
 0x464   :  { %4509 = vmatmul.mubr.msk.bf16.vlgmr.msra.gmra.mrb[8].mxu0 %vm1197_vm3, %v1189_v32  ;;  %4515 = vmatmul.mubr.msk.bf16.vlgmr.msra.gmra.mrb[0].mxu1 %vm1197_vm3, %v1190_v33 }
 0x465   :  { %4519 = vmatpush3.bf16.xpose.msra.mxu0 %v1296_v57  ;;  %4525 = vmatpush3.bf16.xpose.msra.mxu1 %v1343_v19  ;;  %v1191_v44 = vpack.c.bf16 %v581_v20, %v513_v42  ;;  %v1192_v45 = vpack.c.bf16 %v582_v23, %v514_v43 }
 0x466   :  { %4520 = vmatprep.mubr.msk.bf16.mxu0 %vm4977_vm0, %v4976_v0  ;;  %4526 = vmatprep.mubr.msk.bf16.mxu1 %vm4977_vm0, %v4976_v0 }
 0x467   :  { %4530 = vmatprep.subr.bf16.mxu0 %v4976_v0  ;;  %4536 = vmatprep.subr.bf16.mxu1 %v4976_v0 }
 0x46c   :  { %4521 = vmatmul.mubr.msk.bf16.vlgmr.msra.gmra.mrb[12].mxu0 %vm1197_vm3, %v1191_v44  ;;  %4527 = vmatmul.mubr.msk.bf16.vlgmr.msra.gmra.mrb[4].mxu1 %vm1197_vm3, %v1192_v45 }
 0x46d   :  { %4532 = vmatprep.mubr.msk.bf16.mxu0 %vm4977_vm0, %v4976_v0  ;;  %4538 = vmatprep.mubr.msk.bf16.mxu1 %vm4977_vm0, %v4976_v0 }
 0x537   :  { %v1238_v47 = vpop.f32.mrb[8].mxu0  ;;  %v1285_v50 = vpop.f32.mrb[0].mxu1 }
 0x538   :  { %v1239_v53 = vadd.f32 %v1238_v47, %v178_v46  ;;  %v4510_v54 = vpop.f32.mrb[9].mxu0  ;;  %v4516_v55 = vpop.f32.mrb[1].mxu1  ;;  %v1286_v3 = vadd.f32 %v1285_v50, %v178_v46 }
 0x539   :  { %v1241_v7 = vpop.f32.mrb[10].mxu0  ;;  %v1288_v2 = vpop.f32.mrb[2].mxu1 }
 0x53a   :  { %v1242_v5 = vadd.f32 %v1241_v7, %v179_v51  ;;  %v4511_v6 = vpop.f32.mrb[11].mxu0  ;;  %v4517_v11 = vpop.f32.mrb[3].mxu1  ;;  %v1386_v12 = vsel %vm129_vm1, %v1239_v53, -inf  ;;  %v1289_v15 = vadd.f32 %v1288_v2, %v179_v51  ;;  %v1392_v16 = vsel %vm129_vm1, %v1286_v3, -inf }
 0x53b   :  { %1387 = vmax.xlane.f32.xlu0 %v1386_v12 }
 0x53c   :  { %v1389_v14 = vsel %vm129_vm1, %v1242_v5, -inf  ;;  %v1395_v8 = vsel %vm129_vm1, %v1289_v15, -inf }
 0x53d   :  { %1390 = vmax.xlane.f32.xlu1 %v1389_v14 }
 0x53f   :  { %v1379_v18 = vpop.f32.mrb[4].mxu1  ;;  %1393 = vmax.xlane.f32.xlu0 %v1392_v16  ;;  %v1332_v25 = vpop.f32.mrb[12].mxu0 }
 0x540   :  { %v4522_v21 = vpop.f32.mrb[13].mxu0  ;;  %v4528_v22 = vpop.f32.mrb[5].mxu1  ;;  %v1333_v28 = vadd.f32 %v1332_v25, %v178_v46  ;;  %v1380_v9 = vadd.f32 %v1379_v18, %v178_v46 }
 0x541   :  { %v1335_v26 = vpop.f32.mrb[14].mxu0  ;;  %v1382_v27 = vpop.f32.mrb[6].mxu1 }
 0x542   :  { %v4523_v48 = vpop.f32.mrb[15].mxu0  ;;  %v4529_v49 = vpop.f32.mrb[7].mxu1  ;;  %v1398_v4 = vsel %vm129_vm1, %v1333_v28, -inf  ;;  %v1404_v29 = vsel %vm129_vm1, %v1380_v9, -inf  ;;  %v1336_v30 = vadd.f32 %v1335_v26, %v179_v51  ;;  %v1383_v31 = vadd.f32 %v1382_v27, %v179_v51 }
 0x543   :  { %1396 = vmax.xlane.f32.xlu0 %v1395_v8 }
 0x544   :  { %v1401_v32 = vsel %vm129_vm1, %v1336_v30, -inf }
 0x547   :  { %1399 = vmax.xlane.f32.xlu0 %v1398_v4 }
 0x54b   :  { %1405 = vmax.xlane.f32.xlu0 %v1404_v29 }
 0x54e   :  { %895 = vrot.lane.b32.xlu1 %v5188_v56, %s4969_s15  ;;  %v1407_v56 = vsel %vm129_vm1, %v1383_v31, -inf }
 0x552   :  { %897 = vrot.lane.b32.xlu1 %v5214_v60, %s4969_s15 }
 0x556   :  { %899 = vrot.lane.b32.xlu1 %v5218_v61, %s4969_s15 }
 0x561   :  { %893 = vrot.lane.b32.xlu0 %v5182_v52, %s4969_s15 }
 0x565   :  { %901 = vrot.lane.b32.xlu0 %v5212_v59, %s4969_s15 }
 0x569   :  { %905 = vrot.lane.b32.xlu0 %v5224_v62, %s4969_s15 }
 0x57a   :  { %1402 = vmax.xlane.f32.xlu1 %v1401_v32 }
 0x57e   :  { %1408 = vmax.xlane.f32.xlu1 %v1407_v56 }
 0x58f   :  { %903 = vrot.lane.b32.xlu1 %v5226_v63, %s4969_s15 }
 0x5c8   :  { %v1388_v60 = vpop.xlane.xlu0 %1387 }
 0x5c9   :  { %v1410_v61 = vsub.f32 %v1239_v53, %v1388_v60 }
 0x5ca   :  { %v1391_v52 = vpop.xlane.xlu1 %1390 }
 0x5cb   :  { %v1418_v33 = vmul.f32 1.442695, %v1410_v61  ;;  %v1411_v34 = vsub.f32 %v1242_v5, %v1391_v52 }
 0x5cc   :  { %v1394_v59 = vpop.xlane.xlu0 %1393 }
 0x5cd   :  { %4743 = vpow2.f32 %v1418_v33  ;;  %v1420_v37 = vmul.f32 1.442695, %v1411_v34  ;;  %v1412_v62 = vsub.f32 %v1286_v3, %v1394_v59 }
 0x5ce   :  { %v896_v3 = vpop.permute.xlu1 %895 }
 0x5cf   :  { %4745 = vpow2.f32 %v1420_v37  ;;  %v1422_v38 = vmul.f32 1.442695, %v1412_v62 }
 0x5d0   :  { %v1397_v39 = vpop.xlane.xlu0 %1396 }
 0x5d1   :  { %4747 = vpow2.f32 %v1422_v38  ;;  %v1413_v58 = vsub.f32 %v1289_v15, %v1397_v39 }
 0x5d2   :  { %v898_v5 = vpop.permute.xlu1 %897 }
 0x5d3   :  { %v1424_v40 = vmul.f32 1.442695, %v1413_v58 }
 0x5d4   :  { %v1400_v57 = vpop.xlane.xlu0 %1399 }
 0x5d5   :  { %4749 = vpow2.f32 %v1424_v40  ;;  %v1414_v19 = vsub.f32 %v1333_v28, %v1400_v57 }
 0x5d6   :  { %v900_v6 = vpop.permute.xlu1 %899 }
 0x5d7   :  { %v5406_v20 = vpop.eup %4743  ;;  %v1426_v63 = vmul.f32 1.442695, %v1414_v19 }
 0x5d8   :  { %v1406_v23 = vpop.xlane.xlu0 %1405  ;;  %v1434_v42 = vsel %vm129_vm1, %v5406_v20, 0.0 }
 0x5d9   :  { %v5410_v43 = vpop.eup %4745  ;;  %4751 = vpow2.f32 %v1426_v63  ;;  %v1416_v44 = vsub.f32 %v1380_v9, %v1406_v23  ;;  %1435 = vadd.xlane.f32.xlu0 %v1434_v42 }
 0x5da   :  { %v1437_v45 = vsel %vm129_vm1, %v5410_v43, 0.0 }
 0x5db   :  { %v5414_v46 = vpop.eup %4747  ;;  %v1430_v47 = vmul.f32 1.442695, %v1416_v44  ;;  %1438 = vadd.xlane.f32.xlu1 %v1437_v45 }
 0x5dc   :  { %v1440_v50 = vsel %vm129_vm1, %v5414_v46, 0.0  ;;  %v894_v26 = vpop.permute.xlu0 %893 }
 0x5dd   :  { %4753 = vpow2.f32 %v1430_v47  ;;  %1441 = vadd.xlane.f32.xlu0 %v1440_v50 }
 0x5df   :  { %v5418_v51 = vpop.eup %4749 }
 0x5e0   :  { %v1443_v53 = vsel %vm129_vm1, %v5418_v51, 0.0  ;;  %v902_v27 = vpop.permute.xlu0 %901 }
 0x5e1   :  { %1444 = vadd.xlane.f32.xlu1 %v1443_v53  ;;  %v917_v49 = vcombine.low %v894_v26, %v902_v27  ;;  %v918_v9 = vcombine.high %v894_v26, %v902_v27 }
 0x5e3   :  { %v5422_v54 = vpop.eup %4751  ;;  %v925_v29 = vrot.slane %v917_v49, %v5249_v17  ;;  %v932_v32 = vrot.slane %v918_v9, %v5249_v17 }
 0x5e4   :  { %v1446_v55 = vsel %vm129_vm1, %v5422_v54, 0.0  ;;  %v906_v28 = vpop.permute.xlu0 %905 }
 0x5e5   :  { %1447 = vadd.xlane.f32.xlu0 %v1446_v55  ;;  %v933_v48 = vcombine.low %v898_v5, %v906_v28  ;;  %v934_v8 = vcombine.high %v898_v5, %v906_v28 }
 0x5e7   :  { %v5426_v7 = vpop.eup %4753  ;;  %v941_v4 = vrot.slane %v933_v48, %v5249_v17 }
 0x5e8   :  { %v1452_v2 = vsel %vm129_vm1, %v5426_v7, 0.0 }
 0x5e9   :  { %1453 = vadd.xlane.f32.xlu0 %v1452_v2  ;;  %v949_v56 = vcombine.low %v925_v29, %v941_v4  ;;  %v950_v60 = vcombine.high %v925_v29, %v941_v4 }
 0x5eb   :  { %v957_v34 = vrot.slane %v949_v56, %v5252_v24  ;;  %v964_v59 = vrot.slane %v950_v60, %v5252_v24 }
 0x5ed   :  { %v1053_v58 = vcombine.low %v957_v34, %v964_v59  ;;  %v4339_v19 = vcombine.high %v957_v34, %v964_v59 }
 0x5ef   :  { %v1060_v47 = vrot.slane %v1053_v58, %v5249_v17 }
 0x5f2   :  { %907 = vrot.lane.b32.xlu1 %v5232_v1, %s4969_s15 }
 0x607   :  { %v1403_v11 = vpop.xlane.xlu1 %1402 }
 0x608   :  { %v1415_v12 = vsub.f32 %v1336_v30, %v1403_v11  ;;  %v948_v30 = vrot.slane %v934_v8, %v5249_v17 }
 0x60a   :  { %v1428_v14 = vmul.f32 1.442695, %v1415_v12  ;;  %v965_v61 = vcombine.low %v932_v32, %v948_v30  ;;  %v966_v52 = vcombine.high %v932_v32, %v948_v30 }
 0x60b   :  { %v1409_v15 = vpop.xlane.xlu1 %1408 }
 0x60c   :  { %4755 = vpow2.f32 %v1428_v14  ;;  %v1417_v16 = vsub.f32 %v1383_v31, %v1409_v15  ;;  %v973_v37 = vrot.slane %v965_v61, %v5252_v24  ;;  %v980_v62 = vrot.slane %v966_v52, %v5252_v24 }
 0x60e   :  { %v1432_v18 = vmul.f32 1.442695, %v1417_v16  ;;  %v1069_v63 = vcombine.low %v973_v37, %v980_v62  ;;  %v4340_v23 = vcombine.high %v973_v37, %v980_v62 }
 0x60f   :  { %v904_v31 = vpop.permute.xlu1 %903 }
 0x610   :  { %4757 = vpow2.f32 %v1432_v18  ;;  %v985_v40 = vcombine.low %v896_v3, %v904_v31  ;;  %v986_v57 = vcombine.high %v896_v3, %v904_v31  ;;  %v1068_v3 = vrot.slane %v4339_v19, %v5249_v17 }
 0x611   :  { %v1076_v11 = vrot.slane %v1069_v63, %v5249_v17  ;;  %v1084_v12 = vrot.slane %v4340_v23, %v5249_v17 }
 0x612   :  { %v993_v50 = vrot.slane %v985_v40, %v5249_v17  ;;  %v1000_v53 = vrot.slane %v986_v57, %v5249_v17  ;;  %v1085_v27 = vcombine.low %v1060_v47, %v1068_v3  ;;  %v1086_v48 = vcombine.high %v1060_v47, %v1068_v3 }
 0x613   :  { %v1101_v28 = vcombine.low %v1076_v11, %v1084_v12  ;;  %v1102_v49 = vcombine.high %v1076_v11, %v1084_v12 }
 0x614   :  { %v1093_v61 = vrot.slane %v1085_v27, %v5252_v24 }
 0x615   :  { %v1109_v52 = vrot.slane %v1101_v28, %v5252_v24  ;;  %v1116_v34 = vrot.slane %v1102_v49, %v5252_v24 }
 0x616   :  { %v5432_v25 = vpop.eup %4755 }
 0x617   :  { %v1449_v21 = vsel %vm129_vm1, %v5432_v25, 0.0 }
 0x618   :  { %1450 = vadd.xlane.f32.xlu1 %v1449_v21 }
 0x61a   :  { %v5436_v22 = vpop.eup %4757 }
 0x61b   :  { %v1455_v1 = vsel %vm129_vm1, %v5436_v22, 0.0 }
 0x61c   :  { %1456 = vadd.xlane.f32.xlu0 %v1455_v1 }
 0x666   :  { %v1436_v39 = vpop.xlane.xlu0 %1435 }
 0x667   :  { %4759 = vrcp.f32 %v1436_v39 }
 0x668   :  { %v1439_v33 = vpop.xlane.xlu1 %1438 }
 0x669   :  { %4761 = vrcp.f32 %v1439_v33  ;;  %v1100_v33 = vrot.slane %v1086_v48, %v5252_v24 }
 0x66a   :  { %v1442_v55 = vpop.xlane.xlu0 %1441 }
 0x66e   :  { %v1445_v38 = vpop.xlane.xlu1 %1444 }
 0x66f   :  { %4763 = vrcp.f32 %v1445_v38 }
 0x670   :  { %4765 = vrcp.f32 %v1442_v55 }
 0x671   :  { %v4760_v60 = vpop.eup %4759 }
 0x672   :  { %v908_v42 = vpop.permute.xlu1 %907 }
 0x673   :  { %v1001_v44 = vcombine.low %v900_v6, %v908_v42  ;;  %v1002_v45 = vcombine.high %v900_v6, %v908_v42  ;;  %v4762_v59 = vpop.eup %4761  ;;  %v1117_v42 = vcombine.low %v1093_v61, %v1109_v52 }
 0x674   :  { %v1467_v55 = vmul.f32 %v4762_v59, %v5410_v43 }
 0x675   :  { %v1009_v2 = vrot.slane %v1001_v44, %v5249_v17  ;;  %v1016_v5 = vrot.slane %v1002_v45, %v5249_v17  ;;  %v1118_v44 = vcombine.high %v1093_v61, %v1109_v52 }
 0x677   :  { %v1017_v6 = vcombine.low %v993_v50, %v1009_v2  ;;  %v1018_v14 = vcombine.high %v993_v50, %v1009_v2  ;;  %v1033_v15 = vcombine.low %v1000_v53, %v1016_v5  ;;  %v1034_v16 = vcombine.high %v1000_v53, %v1016_v5 }
 0x678   :  { %v1119_v50 = vcombine.low %v1100_v33, %v1116_v34  ;;  %v1120_v5 = vcombine.high %v1100_v33, %v1116_v34 }
 0x679   :  { %v1025_v18 = vrot.slane %v1017_v6, %v5252_v24  ;;  %v1032_v21 = vrot.slane %v1018_v14, %v5252_v24  ;;  %v1041_v1 = vrot.slane %v1033_v15, %v5252_v24  ;;  %v1048_v26 = vrot.slane %v1034_v16, %v5252_v24  ;;  %v4764_v58 = vpop.eup %4763 }
 0x67a   :  { %v4766_v23 = vpop.eup %4765  ;;  %v1469_v2 = vmul.f32 %v4764_v58, %v5418_v51  ;;  %v1466_v14 = vmul.f32 %v4760_v60, %v5406_v20  ;;  %v1448_v20 = vpop.xlane.xlu0 %1447 }
 0x67b   :  { %v1121_v8 = vcombine.low %v1025_v18, %v1032_v21  ;;  %v4341_v9 = vcombine.high %v1025_v18, %v1032_v21  ;;  %v1137_v4 = vcombine.low %v1041_v1, %v1048_v26  ;;  %v4342_v29 = vcombine.high %v1041_v1, %v1048_v26 }
 0x67c   :  { %v1468_v15 = vmul.f32 %v4766_v23, %v5414_v46  ;;  %v1474_v18 = vpack.c.bf16 %v1467_v55, %v1466_v14  ;;  %4767 = vrcp.f32 %v1448_v20 }
 0x67d   :  { %v1128_v30 = vrot.slane %v1121_v8, %v5249_v17  ;;  %v1136_v31 = vrot.slane %v4341_v9, %v5249_v17  ;;  %v1144_v32 = vrot.slane %v1137_v4, %v5249_v17  ;;  %v1152_v56 = vrot.slane %v4342_v29, %v5249_v17 }
 0x67e   :  { %v1475_v21 = vpack.c.bf16 %v1469_v2, %v1468_v15  ;;  %v1454_v43 = vpop.xlane.xlu0 %1453 }
 0x67f   :  { %v1153_v37 = vcombine.low %v1128_v30, %v1136_v31  ;;  %v1169_v62 = vcombine.low %v1144_v32, %v1152_v56  ;;  %v1154_v38 = vcombine.high %v1128_v30, %v1136_v31  ;;  %v1170_v39 = vcombine.high %v1144_v32, %v1152_v56 }
 0x681   :  { %v1161_v40 = vrot.slane %v1153_v37, %v5252_v24  ;;  %v1177_v57 = vrot.slane %v1169_v62, %v5252_v24  ;;  %v1168_v19 = vrot.slane %v1154_v38, %v5252_v24  ;;  %v1184_v63 = vrot.slane %v1170_v39, %v5252_v24 }
 0x683   :  { %v1185_v45 = vcombine.low %v1161_v40, %v1177_v57  ;;  %v1186_v47 = vcombine.high %v1161_v40, %v1177_v57  ;;  %v1187_v53 = vcombine.low %v1168_v19, %v1184_v63  ;;  %v1188_v3 = vcombine.high %v1168_v19, %v1184_v63 }
 0x685   :  { %v1478_v11 = vpack.c.bf16 %v1185_v45, %v1117_v42  ;;  %v1479_v12 = vpack.c.bf16 %v1186_v47, %v1118_v44  ;;  %v1480_v6 = vpack.c.bf16 %v1187_v53, %v1119_v50  ;;  %v1481_v16 = vpack.c.bf16 %v1188_v3, %v1120_v5 }
 0x686   :  { %v4768_v1 = vpop.eup %4767 }
 0x687   :  { %4531 = vmatpush3.bf16.msra.mxu0 %v1478_v11  ;;  %4537 = vmatpush3.bf16.msra.mxu1 %v1479_v12  ;;  %v1470_v27 = vmul.f32 %v4768_v1, %v5422_v54 }
 0x688   :  { %4542 = vmatprep.subr.bf16.mxu0 %v4976_v0  ;;  %4548 = vmatprep.subr.bf16.mxu1 %v4976_v0 }
 0x68a   :  { %4533 = vmatmul.mubr.msk.bf16.vlgmr.msra.gmra.mrb[16].mxu0 %vm129_vm1, %v1474_v18  ;;  %4539 = vmatmul.mubr.msk.bf16.vlgmr.msra.gmra.mrb[8].mxu1 %vm129_vm1, %v1475_v21 }
 0x68b   :  { %4543 = vmatpush3.bf16.msra.mxu0 %v1480_v6  ;;  %4549 = vmatpush3.bf16.msra.mxu1 %v1481_v16 }
 0x68c   :  { %4544 = vmatprep.mubr.msk.bf16.mxu0 %vm4977_vm0, %v4976_v0  ;;  %4550 = vmatprep.mubr.msk.bf16.mxu1 %vm4977_vm0, %v4976_v0 }
 0x68d   :  { %4554 = vmatprep.subr.bf16.mxu0 %v4976_v0  ;;  %4562 = vmatprep.subr.bf16.mxu1 %v4976_v0 }
 0x6a5   :  { %v1451_v46 = vpop.xlane.xlu1 %1450 }
 0x6a6   :  { %4769 = vrcp.f32 %v1451_v46 }
 0x6a7   :  { %4771 = vrcp.f32 %v1454_v43 }
 0x6a9   :  { %v1457_v51 = vpop.xlane.xlu0 %1456 }
 0x6aa   :  { %4773 = vrcp.f32 %v1457_v51 }
 0x6b0   :  { %v4770_v26 = vpop.eup %4769 }
 0x6b1   :  { %v1471_v28 = vmul.f32 %v4770_v26, %v5432_v25  ;;  %v4772_v48 = vpop.eup %4771 }
 0x6b2   :  { %v1472_v9 = vmul.f32 %v4772_v48, %v5426_v7 }
 0x6b3   :  { %v1476_v49 = vpack.c.bf16 %v1471_v28, %v1470_v27 }
 0x6b4   :  { %v4774_v8 = vpop.eup %4773 }
 0x6b5   :  { %v1473_v4 = vmul.f32 %v4774_v8, %v5436_v22  ;;  %4545 = vmatmul.mubr.msk.bf16.vlgmr.msra.gmra.mrb[20].mxu0 %vm129_vm1, %v1476_v49 }
 0x6b6   :  { %4558 = vmatprep.mubr.msk.bf16.mxu0 %vm4977_vm0, %v4976_v0 }
 0x6b7   :  { %v1477_v29 = vpack.c.bf16 %v1473_v4, %v1472_v9 }
 0x6b9   :  { %4551 = vmatmul.mubr.msk.bf16.vlgmr.msra.gmra.mrb[12].mxu1 %vm129_vm1, %v1477_v29 }
 0x6ba   :  { %4566 = vmatprep.mubr.msk.bf16.mxu1 %vm4977_vm0, %v4976_v0 }
 0x75d   :  { %v1519_v54 = vpop.f32.mrb[16].mxu0  ;;  %v1563_v25 = vpop.f32.mrb[8].mxu1 }
 0x75e   :  { %v4534_v30 = vpop.f32.mrb[17].mxu0  ;;  %v4540_v31 = vpop.f32.mrb[9].mxu1 }
 0x75f   :  { %v1522_v32 = vpop.f32.mrb[18].mxu0  ;;  %v1566_v56 = vpop.f32.mrb[10].mxu1 }
 0x760   :  { %v4535_v7 = vpop.f32.mrb[19].mxu0  ;;  %v4541_v60 = vpop.f32.mrb[11].mxu1 }
 0x788   :  { %v1607_v22 = vpop.f32.mrb[20].mxu0 }
 0x789   :  { %v1658_v61 = vcombine.low %v1519_v54, %v1607_v22  ;;  %v1659_v52 = vcombine.high %v1519_v54, %v1607_v22  ;;  %v4546_v33 = vpop.f32.mrb[21].mxu0  ;;  %v4721_v22 = vld [vmem:[%s6095_s7] sm:$0xff]  }
 0x78a   :  { %v1610_v34 = vpop.f32.mrb[22].mxu0  ;;  %4555 = vmatpush3.bf16.msra.mxu0 %v4721_v22 }
 0x78b   :  { %v1726_v59 = vcombine.low %v1522_v32, %v1610_v34  ;;  %v1727_v37 = vcombine.high %v1522_v32, %v1610_v34  ;;  %v4547_v62 = vpop.f32.mrb[23].mxu0  ;;  %v1666_v57 = vrot.slane %v1658_v61, %v5249_v17  ;;  %v1673_v19 = vrot.slane %v1659_v52, %v5249_v17  ;;  %4556 = vmatprep.subr.bf16.mxu0 %v4976_v0 }
 0x78c   :  { %v1651_v38 = vpop.f32.mrb[12].mxu1 }
 0x78d   :  { %v1674_v39 = vcombine.low %v1563_v25, %v1651_v38  ;;  %v1675_v58 = vcombine.high %v1563_v25, %v1651_v38  ;;  %v4552_v40 = vpop.f32.mrb[13].mxu1  ;;  %v1734_v5 = vrot.slane %v1726_v59, %v5249_v17  ;;  %v1741_v3 = vrot.slane %v1727_v37, %v5249_v17 }
 0x78e   :  { %v1654_v63 = vpop.f32.mrb[14].mxu1 }
 0x78f   :  { %v1682_v23 = vrot.slane %v1674_v39, %v5249_v17  ;;  %v1689_v42 = vrot.slane %v1675_v58, %v5249_v17  ;;  %v1742_v44 = vcombine.low %v1566_v56, %v1654_v63  ;;  %v1743_v45 = vcombine.high %v1566_v56, %v1654_v63  ;;  %v4553_v47 = vpop.f32.mrb[15].mxu1 }
 0x791   :  { %v1690_v50 = vcombine.low %v1666_v57, %v1682_v23  ;;  %v1691_v53 = vcombine.high %v1666_v57, %v1682_v23  ;;  %v1706_v55 = vcombine.low %v1673_v19, %v1689_v42  ;;  %v1707_v2 = vcombine.high %v1673_v19, %v1689_v42 }
 0x792   :  { %v1750_v11 = vrot.slane %v1742_v44, %v5249_v17  ;;  %v1757_v12 = vrot.slane %v1743_v45, %v5249_v17 }
 0x793   :  { %v1698_v6 = vrot.slane %v1690_v50, %v5252_v24  ;;  %v1705_v14 = vrot.slane %v1691_v53, %v5252_v24  ;;  %v1714_v15 = vrot.slane %v1706_v55, %v5252_v24  ;;  %v1721_v16 = vrot.slane %v1707_v2, %v5252_v24  ;;  %v4722_v53 = vld [vmem:[%s6095_s7 + $0x8] sm:$0xff]  }
 0x794   :  { %v1758_v18 = vcombine.low %v1734_v5, %v1750_v11  ;;  %v1759_v21 = vcombine.high %v1734_v5, %v1750_v11  ;;  %v1774_v20 = vcombine.low %v1741_v3, %v1757_v12  ;;  %v1775_v43 = vcombine.high %v1741_v3, %v1757_v12  ;;  %4557 = vmatpush3.bf16.msra.mxu0 %v4722_v53 }
 0x795   :  { %v1794_v46 = vcombine.low %v1698_v6, %v1705_v14  ;;  %v4351_v51 = vcombine.high %v1698_v6, %v1705_v14  ;;  %v1810_v1 = vcombine.low %v1714_v15, %v1721_v16  ;;  %v4352_v26 = vcombine.high %v1714_v15, %v1721_v16  ;;  %4570 = vmatprep.subr.bf16.mxu0 %v4976_v0 }
 0x796   :  { %v1766_v27 = vrot.slane %v1758_v18, %v5252_v24  ;;  %v1773_v28 = vrot.slane %v1759_v21, %v5252_v24  ;;  %v1782_v48 = vrot.slane %v1774_v20, %v5252_v24  ;;  %v1789_v49 = vrot.slane %v1775_v43, %v5252_v24 }
 0x797   :  { %v1801_v8 = vrot.slane %v1794_v46, %v5249_v17  ;;  %v1809_v9 = vrot.slane %v4351_v51, %v5249_v17  ;;  %v1817_v4 = vrot.slane %v1810_v1, %v5249_v17  ;;  %v1825_v29 = vrot.slane %v4352_v26, %v5249_v17 }
 0x798   :  { %v1862_v54 = vcombine.low %v1766_v27, %v1773_v28  ;;  %v4353_v25 = vcombine.high %v1766_v27, %v1773_v28  ;;  %v1878_v30 = vcombine.low %v1782_v48, %v1789_v49  ;;  %v4354_v31 = vcombine.high %v1782_v48, %v1789_v49 }
 0x799   :  { %v1827_v32 = vcombine.high %v1801_v8, %v1809_v9  ;;  %v1843_v56 = vcombine.high %v1817_v4, %v1825_v29  ;;  %v1826_v7 = vcombine.low %v1801_v8, %v1809_v9  ;;  %v1842_v60 = vcombine.low %v1817_v4, %v1825_v29  ;;  %v5552_v4 = vld [vmem:[%s6096_s8] sm:$0x3f] }
 0x79a   :  { %v1869_v61 = vrot.slane %v1862_v54, %v5249_v17  ;;  %v1877_v52 = vrot.slane %v4353_v25, %v5249_v17  ;;  %v1885_v33 = vrot.slane %v1878_v30, %v5249_v17  ;;  %v1893_v34 = vrot.slane %v4354_v31, %v5249_v17 }
 0x79b   :  { %v1841_v59 = vrot.slane %v1827_v32, %v5252_v24  ;;  %v1857_v37 = vrot.slane %v1843_v56, %v5252_v24  ;;  %v1834_v62 = vrot.slane %v1826_v7, %v5252_v24  ;;  %v1850_v38 = vrot.slane %v1842_v60, %v5252_v24 }
 0x79c   :  { %v1895_v39 = vcombine.high %v1869_v61, %v1877_v52  ;;  %v1911_v58 = vcombine.high %v1885_v33, %v1893_v34  ;;  %v1894_v40 = vcombine.low %v1869_v61, %v1877_v52  ;;  %v1910_v57 = vcombine.low %v1885_v33, %v1893_v34 }
 0x79d   :  { %v1860_v19 = vcombine.low %v1841_v59, %v1857_v37  ;;  %v1858_v63 = vcombine.low %v1834_v62, %v1850_v38  ;;  %v1859_v23 = vcombine.high %v1834_v62, %v1850_v38  ;;  %v1861_v42 = vcombine.high %v1841_v59, %v1857_v37 }
 0x79e   :  { %v1909_v44 = vrot.slane %v1895_v39, %v5252_v24  ;;  %v1925_v45 = vrot.slane %v1911_v58, %v5252_v24  ;;  %v1902_v47 = vrot.slane %v1894_v40, %v5252_v24  ;;  %v1918_v50 = vrot.slane %v1910_v57, %v5252_v24  ;;  %v4723_v58 = vld [vmem:[%s6097_s9] sm:$0xff]   ;;  %v4724_v40 = vld [vmem:[%s6097_s9 + $0x8] sm:$0xff]  }
 0x79f   :  { %v1968_v9 = vsub.s32 4, %v5168_v35  ;;  %4563 = vmatpush3.bf16.msra.mxu1 %v4723_v58  ;;  %v4725_v57 = vld [vmem:[%s6099_s11] sm:$0xff]   ;;  %v4729_v58 = vld [vmem:[%s6093_s5 + $0x10] sm:$0xff]  }
 0x7a0   :  { %v1928_v55 = vcombine.low %v1909_v44, %v1925_v45  ;;  %v1927_v2 = vcombine.high %v1902_v47, %v1918_v50  ;;  %v1926_v5 = vcombine.low %v1902_v47, %v1918_v50  ;;  %v1929_v3 = vcombine.high %v1909_v44, %v1925_v45  ;;  %4564 = vmatprep.subr.bf16.mxu1 %v4976_v0 }
 0x7a1   :  { %v1969_v29 = vrot.slane %v5552_v4, %v1968_v9  ;;  %v2056_v50 = vsub.s32 2, %v5168_v35 }
 0x7a2   :  { %v4692_v11 = vpack.i.bf16 %v1928_v55, %v1860_v19  ;;  %v4687_v12 = vpack.i.bf16 %v1927_v2, %v1859_v23  ;;  %v4697_v6 = vpack.i.bf16 %v1929_v3, %v1861_v42  ;;  %v4726_v19 = vld [vmem:[%s6099_s11 + $0x8] sm:$0xff]  }
 0x7a3   :  { %4565 = vmatpush3.bf16.msra.mxu1 %v4724_v40  ;;  %v2057_v55 = vrot.slane %v5552_v4, %v2056_v50  ;;  %v4730_v40 = vld [vmem:[%s6093_s5 + $0x18] sm:$0xff]  }
 0x7a4   :  { %4693 = vrot.lane.b32.xlu1 %v4692_v11, %s4971_s3  ;;  %4688 = vrot.lane.b32.xlu0 %v4687_v12, %s4984_s10 }
 0x7a5   :  { %4582 = vmatprep.subr.bf16.mxu1 %v4976_v0 }
 0x7a8   :  { %4698 = vrot.lane.b32.xlu1 %v4697_v6, %s4985_s22 }
 0x816   :  { %v4694_v14 = vpop.permute.xlu1 %4693  ;;  %v4689_v15 = vpop.permute.xlu0 %4688 }
 0x817   :  { %v4691_v16 = vunpack.i.h.bf16 %v4689_v15  ;;  %v4690_v18 = vunpack.i.l.bf16 %v4689_v15  ;;  %v4696_v21 = vunpack.i.h.bf16 %v4694_v14  ;;  %v4695_v20 = vunpack.i.l.bf16 %v4694_v14 }
 0x819   :  { %v1954_v43 = vsel %vm1197_vm3, %v1858_v63, %v4690_v18  ;;  %v1955_v46 = vsel %vm1197_vm3, %v1926_v5, %v4691_v16  ;;  %v2062_v5 = vsub.s32 3, %v5168_v35 }
 0x81a   :  { %v4699_v51 = vpop.permute.xlu1 %4698  ;;  %v1956_v27 = vsel %vm129_vm1, %v1954_v43, %v4695_v20  ;;  %v1957_v28 = vsel %vm129_vm1, %v1955_v46, %v4696_v21  ;;  %v4727_v21 = vld [vmem:[%s6099_s11 + $0x10] sm:$0xff]   ;;  %v4728_v20 = vld [vmem:[%s6099_s11 + $0x18] sm:$0xff]  }
 0x81b   :  { %v4701_v1 = vunpack.i.h.bf16 %v4699_v51  ;;  %v4700_v26 = vunpack.i.l.bf16 %v4699_v51  ;;  %v2063_v6 = vrot.slane %v5552_v4, %v2062_v5  ;;  %v4358_v43 = vld [vmem:[#allocation10] ss:$0 sm:$0xff] }
 0x81d   :  { %v1959_v48 = vsel %vm1958_vm4, %v1956_v27, %v4700_v26  ;;  %v1960_v49 = vsel %vm1958_vm4, %v1957_v28, %v4701_v1 }
 0x81e   :  { %v1961_v8 = vpack.c.bf16 %v1960_v49, %v1959_v48 }
 0x820   :  { %4559 = vmatmul.mubr.msk.bf16.vlgmr.msra.gmra.mrb[24].mxu0 %vm181_vm2, %v1961_v8 }
 0x821   :  { %4578 = vmatprep.mubr.msk.bf16.mxu0 %vm4977_vm0, %v4976_v0  ;;  %4571 = vmatpush3.bf16.msra.mxu0 %v4725_v57 }
 0x822   :  { %4572 = vmatprep.subr.bf16.mxu0 %v4976_v0 }
 0x825   :  { %4573 = vmatpush3.bf16.msra.mxu0 %v4726_v19 }
 0x826   :  { %4574 = vmatprep.subr.bf16.mxu0 %v4976_v0 }
 0x829   :  { %4575 = vmatpush3.bf16.msra.mxu0 %v4727_v21 }
 0x82a   :  { %4576 = vmatprep.subr.bf16.mxu0 %v4976_v0 }
 0x82d   :  { %4577 = vmatpush3.bf16.msra.mxu0 %v4728_v20 }
 0x82e   :  { %4596 = vmatprep.subr.bf16.mxu0 %v4976_v0 }
 0x8f3   :  { %v2019_v54 = vpop.f32.mrb[24].mxu0 }
 0x8f4   :  { %v2020_v25 = vadd.f32 %v2019_v54, %v1969_v29  ;;  %v4560_v30 = vpop.f32.mrb[25].mxu0 }
 0x8f5   :  { %v2022_v31 = vpop.f32.mrb[26].mxu0 }
 0x8f6   :  { %v5558_v32 = vadd.f32 %v2020_v25, %v5148_v10  ;;  %v2023_v56 = vadd.f32 %v2022_v31, %v1969_v29  ;;  %v4561_v7 = vpop.f32.mrb[27].mxu0  ;;  %v2147_v29 = vsub.s32 5, %v5168_v35 }
 0x8f8   :  { %v5561_v60 = vadd.f32 %v2023_v56, %v5150_v13  ;;  %v2028_v22 = vsel %vm181_vm2, %v5558_v32, 0.0  ;;  %v2148_v54 = vrot.slane %v5552_v4, %v2147_v29 }
 0x8f9   :  { %2029 = vadd.xlane.f32.xlu1 %v2028_v22 }
 0x8fa   :  { %v2031_v61 = vsel %vm181_vm2, %v5561_v60, 0.0 }
 0x8fb   :  { %2032 = vadd.xlane.f32.xlu0 %v2031_v61 }
 0x986   :  { %v2030_v52 = vpop.xlane.xlu1 %2029 }
 0x987   :  { %v2034_v33 = vmul.f32 0.03125, %v2030_v52 }
 0x988   :  { %v2033_v34 = vpop.xlane.xlu0 %2032 }
 0x989   :  { %v2036_v59 = vsub.f32 %v5558_v32, %v2034_v33  ;;  %v2035_v10 = vmul.f32 0.03125, %v2033_v34 }
 0x98b   :  { %v2037_v37 = vsub.f32 %v5561_v60, %v2035_v10  ;;  %v2038_v62 = vmul.f32 %v2036_v59, %v2036_v59 }
 0x98d   :  { %v2040_v13 = vsel %vm181_vm2, %v2038_v62, 0.0  ;;  %v2039_v38 = vmul.f32 %v2037_v37, %v2037_v37 }
 0x98e   :  { %2041 = vadd.xlane.f32.xlu0 %v2040_v13 }
 0x98f   :  { %v2043_v39 = vsel %vm181_vm2, %v2039_v38, 0.0 }
 0x992   :  { %2044 = vadd.xlane.f32.xlu0 %v2043_v39 }
 0xa1b   :  { %v2042_v63 = vpop.xlane.xlu0 %2041 }
 0xa1c   :  { %v2046_v23 = vmul.f32 0.03125, %v2042_v63 }
 0xa1e   :  { %v2048_v42 = vadd.f32 1e-05, %v2046_v23 }
 0xa1f   :  { %v2045_v44 = vpop.xlane.xlu0 %2044 }
 0xa20   :  { %4775 = vrsqrt.f32 %v2048_v42  ;;  %v2047_v45 = vmul.f32 0.03125, %v2045_v44 }
 0xa22   :  { %v2049_v47 = vadd.f32 1e-05, %v2047_v45  ;;  %v4367_v45 = vld [vmem:[%s6096_s8 + $0x8] sm:$0x3f] }
 0xa24   :  { %4777 = vrsqrt.f32 %v2049_v47  ;;  %v2251_v47 = vrot.slane %v4367_v45, %v211_v36 }
 0xa2a   :  { %v4776_v53 = vpop.eup %4775 }
 0xa2b   :  { %v2052_v2 = vmul.f32 %v4776_v53, %v2036_v59 }
 0xa2d   :  { %v2058_v11 = vmul.f32 %v2057_v55, %v2052_v2 }
 0xa2e   :  { %v4778_v3 = vpop.eup %4777 }
 0xa2f   :  { %v2053_v12 = vmul.f32 %v4778_v3, %v2037_v37  ;;  %v2064_v15 = vadd.f32 %v2063_v6, %v2058_v11 }
 0xa31   :  { %v2059_v14 = vmul.f32 %v2057_v55, %v2053_v12  ;;  %v2257_v12 = vrot.slane %v4367_v45, %v217_v41 }
 0xa33   :  { %v2065_v16 = vadd.f32 %v2063_v6, %v2059_v14 }
 0xa35   :  { %v2066_v18 = vpack.c.bf16 %v2065_v16, %v2064_v15 }
 0xa37   :  { %4567 = vmatmul.mubr.msk.bf16.vlgmr.msra.gmra.mrb[16].mxu1 %vm181_vm2, %v2066_v18  ;;  %v4372_v18 = vld [vmem:[#allocation8 + $0x1] ss:$0 sm:$0xff] }
 0xa38   :  { %4586 = vmatprep.mubr.msk.bf16.mxu1 %vm4977_vm0, %v4976_v0  ;;  %4583 = vmatpush3.bf16.msra.mxu1 %v4729_v58 }
 0xa39   :  { %4584 = vmatprep.subr.bf16.mxu1 %v4976_v0 }
 0xa3c   :  { %4585 = vmatpush3.bf16.msra.mxu1 %v4730_v40 }
 0xa3d   :  { %4590 = vmatprep.subr.bf16.mxu1 %v4976_v0 }
 0xb0a   :  { %v2127_v46 = vpop.f32.mrb[16].mxu1 }
 0xb0b   :  { %v2128_v51 = vadd.f32 %v4358_v43, %v2127_v46  ;;  %v4568_v1 = vpop.f32.mrb[17].mxu1 }
 0xb0c   :  { %v2130_v26 = vpop.f32.mrb[18].mxu1 }
 0xb0d   :  { %v2131_v27 = vadd.f32 %v4358_v43, %v2130_v26  ;;  %v4569_v28 = vpop.f32.mrb[19].mxu1  ;;  %v2134_v48 = vmax.f32 %v2128_v51, 0.0 }
 0xb0f   :  { %v2135_v49 = vmax.f32 %v2131_v27, 0.0 }
 0xb11   :  { %v2136_v8 = vpack.c.bf16 %v2135_v49, %v2134_v48 }
 0xb13   :  { %4579 = vmatmul.mubr.msk.bf16.vlgmr.msra.gmra.mrb[28].mxu0 %vm2173_vm5, %v2136_v8 }
 0xb14   :  { %4598 = vmatprep.mubr.msk.bf16.mxu0 %vm4977_vm0, %v4976_v0 }
 0xbe6   :  { %v2211_v25 = vpop.f32.mrb[28].mxu0 }
 0xbe7   :  { %v2212_v30 = vadd.f32 %v2211_v25, %v2148_v54  ;;  %v4580_v31 = vpop.f32.mrb[29].mxu0 }
 0xbe8   :  { %v2214_v56 = vpop.f32.mrb[30].mxu0 }
 0xbe9   :  { %v5614_v7 = vadd.f32 %v2212_v30, %v5558_v32  ;;  %v2215_v22 = vadd.f32 %v2214_v56, %v2148_v54  ;;  %v4581_v61 = vpop.f32.mrb[31].mxu0 }
 0xbeb   :  { %v5617_v52 = vadd.f32 %v2215_v22, %v5561_v60  ;;  %v2222_v33 = vsel %vm181_vm2, %v5614_v7, 0.0 }
 0xbec   :  { %2223 = vadd.xlane.f32.xlu1 %v2222_v33 }
 0xbed   :  { %v2225_v34 = vsel %vm181_vm2, %v5617_v52, 0.0 }
 0xbee   :  { %2226 = vadd.xlane.f32.xlu0 %v2225_v34 }
 0xc79   :  { %v2224_v4 = vpop.xlane.xlu1 %2223 }
 0xc7a   :  { %v2228_v59 = vmul.f32 0.03125, %v2224_v4 }
 0xc7b   :  { %v2227_v10 = vpop.xlane.xlu0 %2226 }
 0xc7c   :  { %v2230_v37 = vsub.f32 %v5614_v7, %v2228_v59  ;;  %v2229_v32 = vmul.f32 0.03125, %v2227_v10 }
 0xc7e   :  { %v2231_v62 = vsub.f32 %v5617_v52, %v2229_v32  ;;  %v2232_v13 = vmul.f32 %v2230_v37, %v2230_v37 }
 0xc80   :  { %v2234_v60 = vsel %vm181_vm2, %v2232_v13, 0.0  ;;  %v2233_v38 = vmul.f32 %v2231_v62, %v2231_v62 }
 0xc81   :  { %2235 = vadd.xlane.f32.xlu1 %v2234_v60 }
 0xc82   :  { %v2237_v39 = vsel %vm181_vm2, %v2233_v38, 0.0 }
 0xc83   :  { %2238 = vadd.xlane.f32.xlu0 %v2237_v39 }
 0xd0e   :  { %v2236_v57 = vpop.xlane.xlu1 %2235 }
 0xd0f   :  { %v2240_v19 = vmul.f32 0.03125, %v2236_v57 }
 0xd10   :  { %v2239_v63 = vpop.xlane.xlu0 %2238 }
 0xd11   :  { %v2242_v23 = vadd.f32 1e-05, %v2240_v19  ;;  %v2241_v42 = vmul.f32 0.03125, %v2239_v63 }
 0xd13   :  { %4779 = vrsqrt.f32 %v2242_v23  ;;  %v2243_v44 = vadd.f32 1e-05, %v2241_v42 }
 0xd15   :  { %4781 = vrsqrt.f32 %v2243_v44 }
 0xd1d   :  { %v4780_v53 = vpop.eup %4779 }
 0xd1e   :  { %v2246_v55 = vmul.f32 %v4780_v53, %v2230_v37 }
 0xd1f   :  { %v4782_v2 = vpop.eup %4781 }
 0xd20   :  { %v2252_v3 = vmul.f32 %v2251_v47, %v2246_v55  ;;  %v2247_v11 = vmul.f32 %v4782_v2, %v2231_v62 }
 0xd22   :  { %v2253_v6 = vmul.f32 %v2251_v47, %v2247_v11  ;;  %v2258_v14 = vadd.f32 %v2257_v12, %v2252_v3 }
 0xd24   :  { %v2259_v15 = vadd.f32 %v2257_v12, %v2253_v6 }
 0xd26   :  { %v2260_v16 = vpack.c.bf16 %v2259_v15, %v2258_v14 }
 0xd28   :  { %4587 = vmatmul.mubr.msk.bf16.vlgmr.msra.gmra.mrb[20].mxu1 %vm181_vm2, %v2260_v16 }
 0xd29   :  { %4592 = vmatprep.mubr.msk.bf16.mxu1 %vm4977_vm0, %v4976_v0 }
 0xdfb   :  { %v2323_v21 = vpop.f32.mrb[20].mxu1 }
 0xdfc   :  { %v5645_v36 = vadd.f32 %v4372_v18, %v2323_v21  ;;  %v4588_v20 = vpop.f32.mrb[21].mxu1 }
 0xdfd   :  { %v2326_v43 = vpop.f32.mrb[22].mxu1 }
 0xdfe   :  { %v5647_v46 = vadd.f32 %v4372_v18, %v2326_v43  ;;  %2626 = vrot.lane.b32.xlu1 %v5645_v36, %s4979_s25  ;;  %v4589_v41 = vpop.f32.mrb[23].mxu1  ;;  %v5671_v1 = vmul.f32 0.35355338, %v5645_v36 }
 0xe00   :  { %2628 = vrot.lane.b32.xlu0 %v5647_v46, %s4979_s25  ;;  %v5664_v51 = vmul.f32 0.35355338, %v5647_v46 }
 0xe02   :  { %2630 = vrot.lane.b32.xlu1 %v5645_v36, %s4978_s14 }
 0xe04   :  { %2636 = vrot.lane.b32.xlu0 %v5647_v46, %s4980_s26 }
 0xe06   :  { %2632 = vrot.lane.b32.xlu1 %v5647_v46, %s4978_s14 }
 0xe08   :  { %2640 = vrot.lane.b32.xlu0 %v5647_v46, %s4981_s27 }
 0xe0a   :  { %2634 = vrot.lane.b32.xlu1 %v5645_v36, %s4980_s26 }
 0xe0c   :  { %2336 = vrot.lane.b32.xlu0 %v5664_v51, %s4979_s25 }
 0xe0e   :  { %2638 = vrot.lane.b32.xlu1 %v5645_v36, %s4981_s27 }
 0xe12   :  { %2334 = vrot.lane.b32.xlu1 %v5671_v1, %s4979_s25 }
 0xe70   :  { %v5675_v26 = vpop.permute.xlu1 %2626 }
 0xe71   :  { %2642 = vrot.lane.b32.xlu1 %v5675_v26, %s4981_s27 }
 0xe72   :  { %v5679_v27 = vpop.permute.xlu0 %2628 }
 0xe73   :  { %2644 = vrot.lane.b32.xlu0 %v5679_v27, %s4981_s27 }
 0xe74   :  { %v5683_v28 = vpop.permute.xlu1 %2630 }
 0xe75   :  { %2646 = vrot.lane.b32.xlu1 %v5683_v28, %s4981_s27 }
 0xe76   :  { %v5691_v49 = vpop.permute.xlu0 %2636 }
 0xe78   :  { %v5687_v48 = vpop.permute.xlu1 %2632 }
 0xe79   :  { %2648 = vrot.lane.b32.xlu0 %v5687_v48, %s4981_s27 }
 0xe7a   :  { %v2641_v25 = vpop.permute.xlu0 %2640 }
 0xe7c   :  { %v5693_v8 = vpop.permute.xlu1 %2634 }
 0xe7d   :  { %2650 = vrot.lane.b32.xlu1 %v5693_v8, %s4981_s27  ;;  %2652 = vrot.lane.b32.xlu0 %v5691_v49, %s4981_s27 }
 0xe7e   :  { %v5709_v31 = vpop.permute.xlu0 %2336 }
 0xe80   :  { %v2639_v54 = vpop.permute.xlu1 %2638 }
 0xe81   :  { %2340 = vrot.lane.b32.xlu1 %v5671_v1, %s4978_s14  ;;  %2342 = vrot.lane.b32.xlu0 %v5664_v51, %s4978_s14 }
 0xe84   :  { %v5707_v30 = vpop.permute.xlu1 %2334 }
 0xe85   :  { %2346 = vrot.lane.b32.xlu1 %v5671_v1, %s4980_s26  ;;  %2348 = vrot.lane.b32.xlu0 %v5664_v51, %s4980_s26 }
 0xee3   :  { %v2643_v56 = vpop.permute.xlu1 %2642 }
 0xee5   :  { %v2645_v22 = vpop.permute.xlu0 %2644 }
 0xee7   :  { %v2647_v61 = vpop.permute.xlu1 %2646 }
 0xee8   :  { %v2662_v34 = vcombine.low %v2639_v54, %v2647_v61  ;;  %v2663_v4 = vcombine.high %v2639_v54, %v2647_v61 }
 0xeea   :  { %v2670_v39 = vrot.slane %v2662_v34, %v5249_v17  ;;  %v2677_v58 = vrot.slane %v2663_v4, %v5249_v17 }
 0xeeb   :  { %v2649_v33 = vpop.permute.xlu0 %2648 }
 0xeec   :  { %v2730_v59 = vcombine.low %v2641_v25, %v2649_v33  ;;  %v2731_v10 = vcombine.high %v2641_v25, %v2649_v33 }
 0xeee   :  { %v2738_v23 = vrot.slane %v2730_v59, %v5249_v17  ;;  %v2745_v42 = vrot.slane %v2731_v10, %v5249_v17 }
 0xeef   :  { %v2651_v37 = vpop.permute.xlu1 %2650  ;;  %v2653_v32 = vpop.permute.xlu0 %2652 }
 0xef0   :  { %v2678_v62 = vcombine.low %v2643_v56, %v2651_v37  ;;  %v2679_v13 = vcombine.high %v2643_v56, %v2651_v37  ;;  %v2746_v60 = vcombine.low %v2645_v22, %v2653_v32  ;;  %v2747_v38 = vcombine.high %v2645_v22, %v2653_v32 }
 0xef2   :  { %v2686_v40 = vrot.slane %v2678_v62, %v5249_v17  ;;  %v2693_v57 = vrot.slane %v2679_v13, %v5249_v17  ;;  %v2754_v19 = vrot.slane %v2746_v60, %v5249_v17  ;;  %v2761_v63 = vrot.slane %v2747_v38, %v5249_v17 }
 0xef3   :  { %v2341_v55 = vpop.permute.xlu1 %2340  ;;  %v2343_v2 = vpop.permute.xlu0 %2342 }
 0xef4   :  { %v2694_v44 = vcombine.low %v2670_v39, %v2686_v40  ;;  %v2695_v45 = vcombine.high %v2670_v39, %v2686_v40  ;;  %v2710_v47 = vcombine.low %v2677_v58, %v2693_v57  ;;  %v2711_v53 = vcombine.high %v2677_v58, %v2693_v57 }
 0xef5   :  { %v2762_v3 = vcombine.low %v2738_v23, %v2754_v19  ;;  %v2763_v11 = vcombine.high %v2738_v23, %v2754_v19  ;;  %v2778_v12 = vcombine.low %v2745_v42, %v2761_v63  ;;  %v2779_v6 = vcombine.high %v2745_v42, %v2761_v63 }
 0xef6   :  { %v2702_v14 = vrot.slane %v2694_v44, %v5252_v24  ;;  %v2709_v15 = vrot.slane %v2695_v45, %v5252_v24  ;;  %v2718_v16 = vrot.slane %v2710_v47, %v5252_v24  ;;  %v2725_v18 = vrot.slane %v2711_v53, %v5252_v24 }
 0xef7   :  { %v2770_v21 = vrot.slane %v2762_v3, %v5252_v24  ;;  %v2777_v20 = vrot.slane %v2763_v11, %v5252_v24  ;;  %v2786_v43 = vrot.slane %v2778_v12, %v5252_v24  ;;  %v2793_v41 = vrot.slane %v2779_v6, %v5252_v24  ;;  %v2347_v37 = vpop.permute.xlu1 %2346  ;;  %v2349_v32 = vpop.permute.xlu0 %2348 }
 0xef8   :  { %v2798_v54 = vcombine.low %v2702_v14, %v2709_v15  ;;  %v4380_v25 = vcombine.high %v2702_v14, %v2709_v15  ;;  %v2814_v56 = vcombine.low %v2718_v16, %v2725_v18  ;;  %v4381_v22 = vcombine.high %v2718_v16, %v2725_v18 }
 0xef9   :  { %v2866_v61 = vcombine.low %v2770_v21, %v2777_v20  ;;  %v4382_v33 = vcombine.high %v2770_v21, %v2777_v20  ;;  %v2882_v59 = vcombine.low %v2786_v43, %v2793_v41  ;;  %v4383_v10 = vcombine.high %v2786_v43, %v2793_v41 }
 0xefa   :  { %v5728_v34 = vrot.slane %v2798_v54, %v5249_v17  ;;  %v5731_v4 = vrot.slane %v4380_v25, %v5249_v17  ;;  %v5734_v62 = vrot.slane %v2814_v56, %v5249_v17  ;;  %v5737_v13 = vrot.slane %v4381_v22, %v5249_v17 }
 0xefb   :  { %v5740_v60 = vrot.slane %v2866_v61, %v5249_v17  ;;  %v5743_v38 = vrot.slane %v4382_v33, %v5249_v17  ;;  %v2352_v39 = vcombine.low %v5671_v1, %v2341_v55  ;;  %v2353_v58 = vcombine.high %v5671_v1, %v2341_v55 }
 0xefc   :  { %v2420_v40 = vcombine.low %v5664_v51, %v2343_v2  ;;  %v2421_v57 = vcombine.high %v5664_v51, %v2343_v2  ;;  %v2368_v19 = vcombine.low %v5707_v30, %v2347_v37  ;;  %v2369_v63 = vcombine.high %v5707_v30, %v2347_v37 }
 0xefd   :  { %v2436_v23 = vcombine.low %v5709_v31, %v2349_v32  ;;  %v2437_v42 = vcombine.high %v5709_v31, %v2349_v32  ;;  %v5754_v44 = vrot.slane %v2882_v59, %v5249_v17  ;;  %v5757_v45 = vrot.slane %v4383_v10, %v5249_v17 }
 0xefe   :  { %v2360_v1 = vrot.slane %v2352_v39, %v5249_v17  ;;  %v2367_v47 = vrot.slane %v2353_v58, %v5249_v17  ;;  %v2376_v51 = vrot.slane %v2368_v19, %v5249_v17  ;;  %v2383_v53 = vrot.slane %v2369_v63, %v5249_v17 }
 0xeff   :  { %v2444_v30 = vrot.slane %v2436_v23, %v5249_v17  ;;  %v2451_v55 = vrot.slane %v2437_v42, %v5249_v17  ;;  %v2428_v31 = vrot.slane %v2420_v40, %v5249_v17  ;;  %v2435_v2 = vrot.slane %v2421_v57, %v5249_v17 }
 0xf00   :  { %v2830_v3 = vcombine.low %v5728_v34, %v5731_v4  ;;  %v2846_v11 = vcombine.low %v5734_v62, %v5737_v13  ;;  %v2384_v12 = vcombine.low %v2360_v1, %v2376_v51  ;;  %v2385_v6 = vcombine.high %v2360_v1, %v2376_v51 }
 0xf01   :  { %v2400_v14 = vcombine.low %v2367_v47, %v2383_v53  ;;  %v2401_v15 = vcombine.high %v2367_v47, %v2383_v53  ;;  %v2452_v16 = vcombine.low %v2428_v31, %v2444_v30  ;;  %v2453_v18 = vcombine.high %v2428_v31, %v2444_v30 }
 0xf02   :  { %v2468_v21 = vcombine.low %v2435_v2, %v2451_v55  ;;  %v2469_v20 = vcombine.high %v2435_v2, %v2451_v55  ;;  %v2392_v43 = vrot.slane %v2384_v12, %v5252_v24  ;;  %v2399_v41 = vrot.slane %v2385_v6, %v5252_v24 }
 0xf03   :  { %v2408_v54 = vrot.slane %v2400_v14, %v5252_v24  ;;  %v2415_v25 = vrot.slane %v2401_v15, %v5252_v24  ;;  %v2460_v56 = vrot.slane %v2452_v16, %v5252_v24  ;;  %v2467_v22 = vrot.slane %v2453_v18, %v5252_v24 }
 0xf04   :  { %v2476_v61 = vrot.slane %v2468_v21, %v5252_v24  ;;  %v2483_v33 = vrot.slane %v2469_v20, %v5252_v24  ;;  %v2488_v59 = vcombine.low %v2392_v43, %v2399_v41  ;;  %v4376_v10 = vcombine.high %v2392_v43, %v2399_v41 }
 0xf05   :  { %v2504_v37 = vcombine.low %v2408_v54, %v2415_v25  ;;  %v4377_v32 = vcombine.high %v2408_v54, %v2415_v25  ;;  %v2556_v39 = vcombine.low %v2460_v56, %v2467_v22  ;;  %v4378_v58 = vcombine.high %v2460_v56, %v2467_v22 }
 0xf06   :  { %v2572_v40 = vcombine.low %v2476_v61, %v2483_v33  ;;  %v4379_v57 = vcombine.high %v2476_v61, %v2483_v33  ;;  %v2495_v19 = vrot.slane %v2488_v59, %v5249_v17  ;;  %v2503_v63 = vrot.slane %v4376_v10, %v5249_v17 }
 0xf07   :  { %v2511_v23 = vrot.slane %v2504_v37, %v5249_v17  ;;  %v2519_v42 = vrot.slane %v4377_v32, %v5249_v17  ;;  %v2563_v1 = vrot.slane %v2556_v39, %v5249_v17  ;;  %v2571_v47 = vrot.slane %v4378_v58, %v5249_v17 }
 0xf08   :  { %v2579_v51 = vrot.slane %v2572_v40, %v5249_v17  ;;  %v2587_v53 = vrot.slane %v4379_v57, %v5249_v17  ;;  %v2520_v30 = vcombine.low %v2495_v19, %v2503_v63  ;;  %v2898_v31 = vcombine.low %v5740_v60, %v5743_v38 }
 0xf09   :  { %v2536_v55 = vcombine.low %v2511_v23, %v2519_v42  ;;  %v2914_v2 = vcombine.low %v5754_v44, %v5757_v45  ;;  %v2588_v12 = vcombine.low %v2563_v1, %v2571_v47  ;;  %v2838_v21 = vrot.slane %v2830_v3, %v5252_v24 }
 0xf0a   :  { %v2604_v6 = vcombine.low %v2579_v51, %v2587_v53  ;;  %v2528_v14 = vrot.slane %v2520_v30, %v5252_v24  ;;  %v2854_v20 = vrot.slane %v2846_v11, %v5252_v24  ;;  %v2906_v43 = vrot.slane %v2898_v31, %v5252_v24 }
 0xf0b   :  { %v2544_v15 = vrot.slane %v2536_v55, %v5252_v24  ;;  %v2596_v16 = vrot.slane %v2588_v12, %v5252_v24  ;;  %v2922_v41 = vrot.slane %v2914_v2, %v5252_v24  ;;  %v2521_v54 = vcombine.high %v2495_v19, %v2503_v63 }
 0xf0c   :  { %v2612_v18 = vrot.slane %v2604_v6, %v5252_v24  ;;  %v2537_v25 = vcombine.high %v2511_v23, %v2519_v42  ;;  %v2862_v56 = vcombine.low %v2838_v21, %v2854_v20  ;;  %v2863_v61 = vcombine.high %v2838_v21, %v2854_v20 }
 0xf0d   :  { %v2930_v22 = vcombine.low %v2906_v43, %v2922_v41  ;;  %v2931_v33 = vcombine.high %v2906_v43, %v2922_v41  ;;  %v2552_v59 = vcombine.low %v2528_v14, %v2544_v15  ;;  %v2831_v37 = vcombine.high %v5728_v34, %v5731_v4 }
 0xf0e   :  { %v2620_v10 = vcombine.low %v2596_v16, %v2612_v18  ;;  %v2847_v3 = vcombine.high %v5734_v62, %v5737_v13  ;;  %v2899_v39 = vcombine.high %v5740_v60, %v5743_v38  ;;  %v2915_v58 = vcombine.high %v5754_v44, %v5757_v45 }
 0xf0f   :  { %v3234_v32 = vpack.c.bf16 %v2930_v22, %v2862_v56  ;;  %v3235_v11 = vpack.c.bf16 %v2931_v33, %v2863_v61  ;;  %v2553_v40 = vcombine.high %v2528_v14, %v2544_v15  ;;  %v2621_v57 = vcombine.high %v2596_v16, %v2612_v18 }
 0xf10   :  { %v2845_v19 = vrot.slane %v2831_v37, %v5252_v24  ;;  %v2861_v63 = vrot.slane %v2847_v3, %v5252_v24  ;;  %v2913_v4 = vrot.slane %v2899_v39, %v5252_v24  ;;  %v2929_v62 = vrot.slane %v2915_v58, %v5252_v24 }
 0xf11   :  { %v3242_v23 = vsel %vm1197_vm3, %v3234_v32, 0  ;;  %v3289_v34 = vsel %vm1197_vm3, %v3235_v11, 0  ;;  %v2589_v13 = vcombine.high %v2563_v1, %v2571_v47  ;;  %v2605_v44 = vcombine.high %v2579_v51, %v2587_v53 }
 0xf12   :  { %4591 = vmatpush3.bf16.xpose.msra.mxu1 %v3242_v23  ;;  %4597 = vmatpush3.bf16.xpose.msra.mxu0 %v3289_v34  ;;  %v2864_v60 = vcombine.low %v2845_v19, %v2861_v63  ;;  %v2865_v38 = vcombine.high %v2845_v19, %v2861_v63  ;;  %v2932_v45 = vcombine.low %v2913_v4, %v2929_v62 }
 0xf13   :  { %4602 = vmatprep.subr.bf16.mxu1 %v4976_v0  ;;  %4608 = vmatprep.subr.bf16.mxu0 %v4976_v0  ;;  %v2933_v42 = vcombine.high %v2913_v4, %v2929_v62  ;;  %v3230_v30 = vpack.c.bf16 %v2620_v10, %v2552_v59  ;;  %v3231_v55 = vpack.c.bf16 %v2621_v57, %v2553_v40  ;;  %v4825_v10 = vld [vmem:[%s6089_s1 + $0x8] sm:$0xff] }
 0xf14   :  { %v3236_v31 = vpack.c.bf16 %v2932_v45, %v2864_v60  ;;  %v2535_v12 = vrot.slane %v2521_v54, %v5252_v24  ;;  %v2551_v6 = vrot.slane %v2537_v25, %v5252_v24  ;;  %v2603_v1 = vrot.slane %v2589_v13, %v5252_v24  ;;  %v4824_v54 = vld [vmem:[%s6089_s1] sm:$0xff] }
 0xf15   :  { %v3237_v2 = vpack.c.bf16 %v2933_v42, %v2865_v38  ;;  %v2619_v47 = vrot.slane %v2605_v44, %v5252_v24 }
 0xf16   :  { %v3336_v51 = vsel %vm1197_vm3, %v3236_v31, 0  ;;  %v2554_v14 = vcombine.low %v2535_v12, %v2551_v6  ;;  %v2555_v16 = vcombine.high %v2535_v12, %v2551_v6 }
 0xf17   :  { %v3383_v53 = vsel %vm1197_vm3, %v3237_v2, 0  ;;  %v2622_v15 = vcombine.low %v2603_v1, %v2619_v47  ;;  %v2623_v18 = vcombine.high %v2603_v1, %v2619_v47 }
 0xf19   :  { %4593 = vmatmul.mubr.msk.bf16.vlgmr.msra.gmra.mrb[24].mxu1 %vm1197_vm3, %v3230_v30  ;;  %4599 = vmatmul.mubr.msk.bf16.vlgmr.msra.gmra.mrb[32].mxu0 %vm1197_vm3, %v3231_v55  ;;  %v3232_v21 = vpack.c.bf16 %v2622_v15, %v2554_v14  ;;  %v3233_v20 = vpack.c.bf16 %v2623_v18, %v2555_v16 }
 0xf1a   :  { %4603 = vmatpush3.bf16.xpose.msra.mxu1 %v3336_v51  ;;  %4609 = vmatpush3.bf16.xpose.msra.mxu0 %v3383_v53 }
 0xf1b   :  { %4604 = vmatprep.mubr.msk.bf16.mxu1 %vm4977_vm0, %v4976_v0  ;;  %4610 = vmatprep.mubr.msk.bf16.mxu0 %vm4977_vm0, %v4976_v0 }
 0xf1c   :  { %4614 = vmatprep.subr.bf16.mxu1 %v4976_v0  ;;  %4620 = vmatprep.subr.bf16.mxu0 %v4976_v0 }
 0xf21   :  { %4605 = vmatmul.mubr.msk.bf16.vlgmr.msra.gmra.mrb[28].mxu1 %vm1197_vm3, %v3232_v21  ;;  %4611 = vmatmul.mubr.msk.bf16.vlgmr.msra.gmra.mrb[36].mxu0 %vm1197_vm3, %v3233_v20 }
 0xf22   :  { %4616 = vmatprep.mubr.msk.bf16.mxu1 %vm4977_vm0, %v4976_v0  ;;  %4622 = vmatprep.mubr.msk.bf16.mxu0 %vm4977_vm0, %v4976_v0 }
 0xfec   :  { %v3278_v43 = vpop.f32.mrb[24].mxu1  ;;  %v3325_v41 = vpop.f32.mrb[32].mxu0 }
 0xfed   :  { %v3279_v25 = vadd.f32 %v4824_v54, %v3278_v43  ;;  %v3326_v56 = vadd.f32 %v4824_v54, %v3325_v41  ;;  %v4594_v22 = vpop.f32.mrb[25].mxu1  ;;  %v4600_v61 = vpop.f32.mrb[33].mxu0 }
 0xfee   :  { %v3281_v33 = vpop.f32.mrb[26].mxu1  ;;  %v3328_v59 = vpop.f32.mrb[34].mxu0 }
 0xfef   :  { %v3282_v37 = vadd.f32 %v4825_v10, %v3281_v33  ;;  %v4595_v3 = vpop.f32.mrb[27].mxu1  ;;  %v4601_v32 = vpop.f32.mrb[35].mxu0  ;;  %v3426_v11 = vsel %vm129_vm1, %v3279_v25, -inf  ;;  %v3432_v39 = vsel %vm129_vm1, %v3326_v56, -inf  ;;  %v3329_v58 = vadd.f32 %v4825_v10, %v3328_v59 }
 0xff0   :  { %3427 = vmax.xlane.f32.xlu1 %v3426_v11  ;;  %3433 = vmax.xlane.f32.xlu0 %v3432_v39 }
 0xff1   :  { %v3429_v40 = vsel %vm129_vm1, %v3282_v37, -inf  ;;  %v3435_v42 = vsel %vm129_vm1, %v3329_v58, -inf }
 0xff4   :  { %v3372_v57 = vpop.f32.mrb[28].mxu1  ;;  %3430 = vmax.xlane.f32.xlu0 %v3429_v40  ;;  %v3419_v19 = vpop.f32.mrb[36].mxu0 }
 0xff5   :  { %v5844_v63 = vadd.f32 %v4824_v54, %v3372_v57  ;;  %v4606_v23 = vpop.f32.mrb[29].mxu1  ;;  %v4612_v34 = vpop.f32.mrb[37].mxu0  ;;  %v3420_v13 = vadd.f32 %v4824_v54, %v3419_v19 }
 0xff6   :  { %v3375_v4 = vpop.f32.mrb[30].mxu1  ;;  %v3422_v62 = vpop.f32.mrb[38].mxu0 }
 0xff7   :  { %v3376_v60 = vadd.f32 %v4825_v10, %v3375_v4  ;;  %v4607_v38 = vpop.f32.mrb[31].mxu1  ;;  %v4613_v44 = vpop.f32.mrb[39].mxu0  ;;  %v3438_v45 = vsel %vm129_vm1, %v5844_v63, -inf  ;;  %v3423_v30 = vadd.f32 %v4825_v10, %v3422_v62  ;;  %v3444_v31 = vsel %vm129_vm1, %v3420_v13, -inf }
 0xff8   :  { %3439 = vmax.xlane.f32.xlu1 %v3438_v45  ;;  %3436 = vmax.xlane.f32.xlu0 %v3435_v42 }
 0xff9   :  { %v3441_v55 = vsel %vm129_vm1, %v3376_v60, -inf  ;;  %v3447_v2 = vsel %vm129_vm1, %v3423_v30, -inf }
 0xffc   :  { %3442 = vmax.xlane.f32.xlu0 %v3441_v55  ;;  %3445 = vmax.xlane.f32.xlu1 %v3444_v31 }
0x1000   :  { %3448 = vmax.xlane.f32.xlu0 %v3447_v2 }
0x100d   :  { %2934 = vrot.lane.b32.xlu1 %v5645_v36, %s4969_s15 }
0x1011   :  { %2938 = vrot.lane.b32.xlu1 %v5675_v26, %s4969_s15 }
0x1015   :  { %2940 = vrot.lane.b32.xlu1 %v5679_v27, %s4969_s15 }
0x1016   :  { %2936 = vrot.lane.b32.xlu0 %v5647_v46, %s4969_s15 }
0x1019   :  { %2942 = vrot.lane.b32.xlu1 %v5683_v28, %s4969_s15 }
0x101a   :  { %2944 = vrot.lane.b32.xlu0 %v5687_v48, %s4969_s15 }
0x101e   :  { %2948 = vrot.lane.b32.xlu0 %v5691_v49, %s4969_s15 }
0x107d   :  { %v3428_v12 = vpop.xlane.xlu1 %3427  ;;  %v3434_v36 = vpop.xlane.xlu0 %3433 }
0x107e   :  { %v3450_v6 = vsub.f32 %v3279_v25, %v3428_v12  ;;  %v3452_v1 = vsub.f32 %v3326_v56, %v3434_v36 }
0x1080   :  { %v3458_v26 = vmul.f32 1.442695, %v3450_v6  ;;  %v3462_v47 = vmul.f32 1.442695, %v3452_v1 }
0x1081   :  { %v3431_v51 = vpop.xlane.xlu0 %3430 }
0x1082   :  { %4783 = vpow2.f32 %v3458_v26  ;;  %v3451_v27 = vsub.f32 %v3282_v37, %v3431_v51 }
0x1083   :  { %4785 = vpow2.f32 %v3462_v47 }
0x1084   :  { %v3460_v46 = vmul.f32 1.442695, %v3451_v27 }
0x1085   :  { %v3440_v53 = vpop.xlane.xlu1 %3439  ;;  %v3437_v14 = vpop.xlane.xlu0 %3436 }
0x1086   :  { %4787 = vpow2.f32 %v3460_v46  ;;  %v3453_v28 = vsub.f32 %v3329_v58, %v3437_v14  ;;  %v3454_v57 = vsub.f32 %v5844_v63, %v3440_v53 }
0x1088   :  { %v3464_v15 = vmul.f32 1.442695, %v3453_v28  ;;  %v3466_v19 = vmul.f32 1.442695, %v3454_v57 }
0x1089   :  { %v3443_v48 = vpop.xlane.xlu0 %3442  ;;  %v3446_v16 = vpop.xlane.xlu1 %3445 }
0x108a   :  { %v3455_v18 = vsub.f32 %v3376_v60, %v3443_v48  ;;  %v3456_v49 = vsub.f32 %v3420_v13, %v3446_v16  ;;  %4789 = vpow2.f32 %v3464_v15 }
0x108c   :  { %v5866_v21 = vpop.eup %4783  ;;  %v3470_v20 = vmul.f32 1.442695, %v3456_v49  ;;  %v3468_v25 = vmul.f32 1.442695, %v3455_v18 }
0x108d   :  { %v3449_v43 = vpop.xlane.xlu0 %3448  ;;  %v3474_v41 = vsel %vm129_vm1, %v5866_v21, 0.0  ;;  %v5870_v54 = vpop.eup %4785 }
0x108e   :  { %v3457_v56 = vsub.f32 %v3423_v30, %v3449_v43  ;;  %3475 = vadd.xlane.f32.xlu1 %v3474_v41  ;;  %4791 = vpow2.f32 %v3470_v20  ;;  %v3480_v61 = vsel %vm129_vm1, %v5870_v54, 0.0  ;;  %v2935_v62 = vpop.permute.xlu1 %2934 }
0x108f   :  { %4793 = vpow2.f32 %v3468_v25 }
0x1090   :  { %v5872_v22 = vpop.eup %4787  ;;  %v3472_v59 = vmul.f32 1.442695, %v3457_v56 }
0x1091   :  { %v3477_v33 = vsel %vm129_vm1, %v5872_v22, 0.0  ;;  %v2937_v4 = vpop.permute.xlu0 %2936 }
0x1092   :  { %3481 = vadd.xlane.f32.xlu1 %v3480_v61  ;;  %3478 = vadd.xlane.f32.xlu0 %v3477_v33  ;;  %4795 = vpow2.f32 %v3472_v59  ;;  %v2939_v60 = vpop.permute.xlu1 %2938 }
0x1093   :  { %4797 = vpow2.f32 %v3466_v19 }
0x1094   :  { %v5878_v10 = vpop.eup %4789 }
0x1095   :  { %v3483_v37 = vsel %vm129_vm1, %v5878_v10, 0.0  ;;  %v2945_v13 = vpop.permute.xlu0 %2944 }
0x1096   :  { %3484 = vadd.xlane.f32.xlu0 %v3483_v37  ;;  %v2941_v44 = vpop.permute.xlu1 %2940  ;;  %v3026_v42 = vcombine.low %v2937_v4, %v2945_v13  ;;  %v3027_v30 = vcombine.high %v2937_v4, %v2945_v13 }
0x1098   :  { %v5882_v3 = vpop.eup %4791  ;;  %v3034_v31 = vrot.slane %v3026_v42, %v5249_v17  ;;  %v3041_v12 = vrot.slane %v3027_v30, %v5249_v17 }
0x1099   :  { %v3492_v32 = vsel %vm129_vm1, %v5882_v3, 0.0  ;;  %v5886_v11 = vpop.eup %4793  ;;  %v2949_v38 = vpop.permute.xlu0 %2948 }
0x109a   :  { %3493 = vadd.xlane.f32.xlu0 %v3492_v32  ;;  %v3489_v39 = vsel %vm129_vm1, %v5886_v11, 0.0  ;;  %v3042_v45 = vcombine.low %v2941_v44, %v2949_v38  ;;  %v2943_v55 = vpop.permute.xlu1 %2942 }
0x109b   :  { %v2958_v14 = vcombine.low %v2935_v62, %v2943_v55  ;;  %v2959_v48 = vcombine.high %v2935_v62, %v2943_v55 }
0x109c   :  { %v5890_v58 = vpop.eup %4795  ;;  %v3050_v63 = vrot.slane %v3042_v45, %v5249_v17 }
0x109d   :  { %v3495_v40 = vsel %vm129_vm1, %v5890_v58, 0.0  ;;  %v5897_v23 = vpop.eup %4797  ;;  %v2966_v41 = vrot.slane %v2958_v14, %v5249_v17  ;;  %v2973_v33 = vrot.slane %v2959_v48, %v5249_v17 }
0x109e   :  { %3490 = vadd.xlane.f32.xlu0 %v3489_v39  ;;  %v3486_v34 = vsel %vm129_vm1, %v5897_v23, 0.0  ;;  %v3058_v36 = vcombine.low %v3034_v31, %v3050_v63  ;;  %v3059_v6 = vcombine.high %v3034_v31, %v3050_v63 }
0x10a0   :  { %v3066_v51 = vrot.slane %v3058_v36, %v5252_v24  ;;  %v3073_v27 = vrot.slane %v3059_v6, %v5252_v24 }
0x10a2   :  { %3496 = vadd.xlane.f32.xlu0 %v3495_v40  ;;  %v3162_v16 = vcombine.low %v3066_v51, %v3073_v27  ;;  %v4386_v25 = vcombine.high %v3066_v51, %v3073_v27 }
0x10a3   :  { %2946 = vrot.lane.b32.xlu1 %v5693_v8, %s4969_s15  ;;  %v3043_v8 = vcombine.high %v2941_v44, %v2949_v38 }
0x10a4   :  { %v3169_v32 = vrot.slane %v3162_v16, %v5249_v17 }
0x10a5   :  { %v3057_v2 = vrot.slane %v3043_v8, %v5249_v17 }
0x10a7   :  { %v3074_v26 = vcombine.low %v3041_v12, %v3057_v2  ;;  %v3075_v47 = vcombine.high %v3041_v12, %v3057_v2 }
0x10a9   :  { %v3082_v28 = vrot.slane %v3074_v26, %v5252_v24  ;;  %v3089_v15 = vrot.slane %v3075_v47, %v5252_v24 }
0x10ab   :  { %v3178_v56 = vcombine.low %v3082_v28, %v3089_v15  ;;  %v4387_v61 = vcombine.high %v3082_v28, %v3089_v15 }
0x10ad   :  { %v3185_v4 = vrot.slane %v3178_v56, %v5249_v17  ;;  %v3193_v62 = vrot.slane %v4387_v61, %v5249_v17 }
0x10af   :  { %v3210_v2 = vcombine.low %v3185_v4, %v3193_v62 }
0x10b1   :  { %v3218_v48 = vrot.slane %v3210_v2, %v5252_v24 }
0x10c7   :  { %3487 = vadd.xlane.f32.xlu1 %v3486_v34  ;;  %v3177_v34 = vrot.slane %v4386_v25, %v5249_v17 }
0x10c9   :  { %v3194_v31 = vcombine.low %v3169_v32, %v3177_v34  ;;  %v3195_v27 = vcombine.high %v3169_v32, %v3177_v34 }
0x10cb   :  { %v3202_v15 = vrot.slane %v3194_v31, %v5252_v24  ;;  %v3209_v25 = vrot.slane %v3195_v27, %v5252_v24 }
0x10cd   :  { %v3227_v32 = vcombine.high %v3202_v15, %v3218_v48 }
0x111b   :  { %v3476_v1 = vpop.xlane.xlu1 %3475 }
0x111c   :  { %4799 = vrcp.f32 %v3476_v1 }
0x111f   :  { %v3482_v46 = vpop.xlane.xlu1 %3481  ;;  %v3479_v53 = vpop.xlane.xlu0 %3478 }
0x1120   :  { %4801 = vrcp.f32 %v3479_v53 }
0x1123   :  { %v2947_v18 = vpop.permute.xlu1 %2946  ;;  %v3485_v43 = vpop.xlane.xlu0 %3484 }
0x1124   :  { %v2974_v49 = vcombine.low %v2939_v60, %v2947_v18  ;;  %v2975_v20 = vcombine.high %v2939_v60, %v2947_v18  ;;  %4803 = vrcp.f32 %v3485_v43 }
0x1125   :  { %4805 = vrcp.f32 %v3482_v46  ;;  %v3211_v46 = vcombine.high %v3185_v4, %v3193_v62 }
0x1126   :  { %v2982_v59 = vrot.slane %v2974_v49, %v5249_v17  ;;  %v2989_v37 = vrot.slane %v2975_v20, %v5249_v17  ;;  %v4800_v26 = vpop.eup %4799 }
0x1127   :  { %v3494_v13 = vpop.xlane.xlu0 %3493  ;;  %v3225_v56 = vrot.slane %v3211_v46, %v5252_v24  ;;  %v3506_v62 = vmul.f32 %v4800_v26, %v5866_v21 }
0x1128   :  { %v2990_v39 = vcombine.low %v2966_v41, %v2982_v59  ;;  %v2991_v40 = vcombine.high %v2966_v41, %v2982_v59  ;;  %v3006_v57 = vcombine.low %v2973_v33, %v2989_v37  ;;  %v3007_v19 = vcombine.high %v2973_v33, %v2989_v37 }
0x1129   :  { %v3226_v59 = vcombine.low %v3202_v15, %v3218_v48 }
0x112a   :  { %v2998_v60 = vrot.slane %v2990_v39, %v5252_v24  ;;  %v3005_v38 = vrot.slane %v2991_v40, %v5252_v24  ;;  %v3014_v44 = vrot.slane %v3006_v57, %v5252_v24  ;;  %v3021_v45 = vrot.slane %v3007_v19, %v5252_v24  ;;  %v4802_v53 = vpop.eup %4801 }
0x112b   :  { %v5921_v63 = vpop.xlane.xlu0 %3490  ;;  %v3507_v39 = vmul.f32 %v4802_v53, %v5872_v22 }
0x112c   :  { %v3094_v42 = vcombine.low %v2998_v60, %v3005_v38  ;;  %v4384_v8 = vcombine.high %v2998_v60, %v3005_v38  ;;  %v3110_v30 = vcombine.low %v3014_v44, %v3021_v45  ;;  %v4385_v55 = vcombine.high %v3014_v44, %v3021_v45 }
0x112d   :  { %v3228_v60 = vcombine.low %v3209_v25, %v3225_v56  ;;  %v3229_v38 = vcombine.high %v3209_v25, %v3225_v56  ;;  %v3514_v44 = vpack.c.bf16 %v3507_v39, %v3506_v62 }
0x112e   :  { %v3101_v12 = vrot.slane %v3094_v42, %v5249_v17  ;;  %v3109_v36 = vrot.slane %v4384_v8, %v5249_v17  ;;  %v3117_v6 = vrot.slane %v3110_v30, %v5249_v17  ;;  %v3125_v1 = vrot.slane %v4385_v55, %v5249_v17  ;;  %v4804_v49 = vpop.eup %4803 }
0x112f   :  { %v3497_v14 = vpop.xlane.xlu0 %3496  ;;  %v4806_v61 = vpop.eup %4805  ;;  %v3509_v40 = vmul.f32 %v4804_v49, %v5878_v10 }
0x1130   :  { %v3126_v47 = vcombine.low %v3101_v12, %v3109_v36  ;;  %v3127_v51 = vcombine.high %v3101_v12, %v3109_v36  ;;  %v3142_v28 = vcombine.low %v3117_v6, %v3125_v1  ;;  %v3143_v16 = vcombine.high %v3117_v6, %v3125_v1 }
0x1131   :  { %4807 = vrcp.f32 %v3497_v14 }
0x1132   :  { %v3134_v18 = vrot.slane %v3126_v47, %v5252_v24  ;;  %4809 = vrcp.f32 %v3494_v13  ;;  %v3150_v20 = vrot.slane %v3142_v28, %v5252_v24  ;;  %v3141_v43 = vrot.slane %v3127_v51, %v5252_v24 }
0x1133   :  { %v3157_v41 = vrot.slane %v3143_v16, %v5252_v24  ;;  %v3508_v13 = vmul.f32 %v4806_v61, %v5870_v54  ;;  %4811 = vrcp.f32 %v5921_v63 }
0x1134   :  { %v3158_v33 = vcombine.low %v3134_v18, %v3150_v20  ;;  %v3159_v37 = vcombine.high %v3134_v18, %v3150_v20 }
0x1135   :  { %v3160_v34 = vcombine.low %v3141_v43, %v3157_v41  ;;  %v3161_v4 = vcombine.high %v3141_v43, %v3157_v41  ;;  %v3515_v45 = vpack.c.bf16 %v3509_v40, %v3508_v13 }
0x1136   :  { %v3518_v57 = vpack.c.bf16 %v3226_v59, %v3158_v33  ;;  %v3519_v19 = vpack.c.bf16 %v3227_v32, %v3159_v37 }
0x1137   :  { %v3520_v22 = vpack.c.bf16 %v3228_v60, %v3160_v34  ;;  %v3521_v10 = vpack.c.bf16 %v3229_v38, %v3161_v4 }
0x1138   :  { %4615 = vmatpush3.bf16.msra.mxu1 %v3518_v57  ;;  %4621 = vmatpush3.bf16.msra.mxu0 %v3519_v19 }
0x1139   :  { %4626 = vmatprep.subr.bf16.mxu1 %v4976_v0  ;;  %4632 = vmatprep.subr.bf16.mxu0 %v4976_v0 }
0x113b   :  { %v4808_v42 = vpop.eup %4807  ;;  %4617 = vmatmul.mubr.msk.bf16.vlgmr.msra.gmra.mrb[32].mxu1 %vm129_vm1, %v3514_v44  ;;  %4623 = vmatmul.mubr.msk.bf16.vlgmr.msra.gmra.mrb[40].mxu0 %vm129_vm1, %v3515_v45 }
0x113c   :  { %v4810_v21 = vpop.eup %4809  ;;  %4627 = vmatpush3.bf16.msra.mxu1 %v3520_v22  ;;  %4633 = vmatpush3.bf16.msra.mxu0 %v3521_v10  ;;  %v3513_v54 = vmul.f32 %v4808_v42, %v5890_v58 }
0x113d   :  { %4634 = vmatprep.mubr.msk.bf16.mxu0 %vm4977_vm0, %v4976_v0  ;;  %4628 = vmatprep.mubr.msk.bf16.mxu1 %vm4977_vm0, %v4976_v0  ;;  %v3512_v8 = vmul.f32 %v4810_v21, %v5882_v3  ;;  %v4812_v55 = vpop.eup %4811 }
0x113e   :  { %4638 = vmatprep.subr.bf16.mxu1 %v4976_v0  ;;  %4646 = vmatprep.subr.bf16.mxu0 %v4976_v0  ;;  %v3511_v2 = vmul.f32 %v4812_v55, %v5886_v11 }
0x113f   :  { %v3517_v30 = vpack.c.bf16 %v3513_v54, %v3512_v8 }
0x1143   :  { %4635 = vmatmul.mubr.msk.bf16.vlgmr.msra.gmra.mrb[44].mxu0 %vm129_vm1, %v3517_v30 }
0x1144   :  { %4650 = vmatprep.mubr.msk.bf16.mxu0 %vm4977_vm0, %v4976_v0 }
0x1154   :  { %v3488_v58 = vpop.xlane.xlu1 %3487 }
0x1155   :  { %4813 = vrcp.f32 %v3488_v58 }
0x115f   :  { %v4814_v31 = vpop.eup %4813 }
0x1160   :  { %v3510_v12 = vmul.f32 %v4814_v31, %v5897_v23 }
0x1162   :  { %v3516_v36 = vpack.c.bf16 %v3511_v2, %v3510_v12 }
0x1164   :  { %4629 = vmatmul.mubr.msk.bf16.vlgmr.msra.gmra.mrb[36].mxu1 %vm129_vm1, %v3516_v36 }
0x1165   :  { %4642 = vmatprep.mubr.msk.bf16.mxu1 %vm4977_vm0, %v4976_v0 }
0x120e   :  { %v3559_v3 = vpop.f32.mrb[32].mxu1  ;;  %v3603_v6 = vpop.f32.mrb[40].mxu0 }
0x120f   :  { %v4618_v1 = vpop.f32.mrb[33].mxu1  ;;  %v4624_v26 = vpop.f32.mrb[41].mxu0 }
0x1210   :  { %v3562_v47 = vpop.f32.mrb[34].mxu1  ;;  %v3606_v63 = vpop.f32.mrb[42].mxu0 }
0x1211   :  { %v4619_v51 = vpop.f32.mrb[35].mxu1  ;;  %v4625_v27 = vpop.f32.mrb[43].mxu0 }
0x1216   :  { %v3691_v46 = vpop.f32.mrb[44].mxu0 }
0x1217   :  { %v3714_v53 = vcombine.low %v3603_v6, %v3691_v46  ;;  %v3715_v14 = vcombine.high %v3603_v6, %v3691_v46  ;;  %v4636_v11 = vpop.f32.mrb[45].mxu0 }
0x1218   :  { %v3694_v28 = vpop.f32.mrb[46].mxu0 }
0x1219   :  { %v3782_v23 = vcombine.low %v3606_v63, %v3694_v28  ;;  %v3783_v15 = vcombine.high %v3606_v63, %v3694_v28  ;;  %v4637_v48 = vpop.f32.mrb[47].mxu0  ;;  %v3722_v43 = vrot.slane %v3714_v53, %v5249_v17  ;;  %v3729_v41 = vrot.slane %v3715_v14, %v5249_v17  ;;  %v4731_v14 = vld [vmem:[%s6095_s7 + $0x10] sm:$0xff]  }
0x121a   :  { %4639 = vmatpush3.bf16.msra.mxu1 %v4731_v14 }
0x121b   :  { %v3790_v19 = vrot.slane %v3782_v23, %v5249_v17  ;;  %v3797_v34 = vrot.slane %v3783_v15, %v5249_v17  ;;  %4640 = vmatprep.subr.bf16.mxu1 %v4976_v0 }
0x1237   :  { %v3647_v16 = vpop.f32.mrb[36].mxu1 }
0x1238   :  { %v3698_v18 = vcombine.low %v3559_v3, %v3647_v16  ;;  %v3699_v49 = vcombine.high %v3559_v3, %v3647_v16  ;;  %v4630_v20 = vpop.f32.mrb[37].mxu1 }
0x1239   :  { %v3650_v25 = vpop.f32.mrb[38].mxu1 }
0x123a   :  { %v3706_v56 = vrot.slane %v3698_v18, %v5249_v17  ;;  %v3713_v61 = vrot.slane %v3699_v49, %v5249_v17  ;;  %v3766_v33 = vcombine.low %v3562_v47, %v3650_v25  ;;  %v3767_v59 = vcombine.high %v3562_v47, %v3650_v25  ;;  %v4631_v37 = vpop.f32.mrb[39].mxu1 }
0x123c   :  { %v3730_v32 = vcombine.low %v3706_v56, %v3722_v43  ;;  %v3731_v39 = vcombine.high %v3706_v56, %v3722_v43  ;;  %v3746_v40 = vcombine.low %v3713_v61, %v3729_v41  ;;  %v3747_v57 = vcombine.high %v3713_v61, %v3729_v41 }
0x123d   :  { %v3774_v4 = vrot.slane %v3766_v33, %v5249_v17  ;;  %v3781_v62 = vrot.slane %v3767_v59, %v5249_v17 }
0x123e   :  { %v3738_v13 = vrot.slane %v3730_v32, %v5252_v24  ;;  %v3745_v60 = vrot.slane %v3731_v39, %v5252_v24  ;;  %v3754_v38 = vrot.slane %v3746_v40, %v5252_v24  ;;  %v3761_v44 = vrot.slane %v3747_v57, %v5252_v24  ;;  %v4732_v40 = vld [vmem:[%s6095_s7 + $0x18] sm:$0xff]  }
0x123f   :  { %v3798_v45 = vcombine.low %v3774_v4, %v3790_v19  ;;  %v3799_v22 = vcombine.high %v3774_v4, %v3790_v19  ;;  %v3814_v10 = vcombine.low %v3781_v62, %v3797_v34  ;;  %v3815_v42 = vcombine.high %v3781_v62, %v3797_v34  ;;  %4641 = vmatpush3.bf16.msra.mxu1 %v4732_v40 }
0x1240   :  { %v3834_v21 = vcombine.low %v3738_v13, %v3745_v60  ;;  %v4396_v54 = vcombine.high %v3738_v13, %v3745_v60  ;;  %v3850_v8 = vcombine.low %v3754_v38, %v3761_v44  ;;  %v4397_v30 = vcombine.high %v3754_v38, %v3761_v44  ;;  %4654 = vmatprep.subr.bf16.mxu1 %v4976_v0 }
0x1241   :  { %v3806_v58 = vrot.slane %v3798_v45, %v5252_v24  ;;  %v3813_v55 = vrot.slane %v3799_v22, %v5252_v24  ;;  %v3822_v31 = vrot.slane %v3814_v10, %v5252_v24  ;;  %v3829_v2 = vrot.slane %v3815_v42, %v5252_v24 }
0x1242   :  { %v3841_v12 = vrot.slane %v3834_v21, %v5249_v17  ;;  %v3849_v36 = vrot.slane %v4396_v54, %v5249_v17  ;;  %v3857_v3 = vrot.slane %v3850_v8, %v5249_v17  ;;  %v3865_v6 = vrot.slane %v4397_v30, %v5249_v17 }
0x1243   :  { %v3902_v1 = vcombine.low %v3806_v58, %v3813_v55  ;;  %v4398_v26 = vcombine.high %v3806_v58, %v3813_v55  ;;  %v3918_v47 = vcombine.low %v3822_v31, %v3829_v2  ;;  %v4399_v63 = vcombine.high %v3822_v31, %v3829_v2 }
0x1244   :  { %v3867_v51 = vcombine.high %v3841_v12, %v3849_v36  ;;  %v3883_v27 = vcombine.high %v3857_v3, %v3865_v6  ;;  %v3866_v46 = vcombine.low %v3841_v12, %v3849_v36  ;;  %v3882_v53 = vcombine.low %v3857_v3, %v3865_v6  ;;  %v6015_v36 = vld [vmem:[%s6096_s8 + $0x8] sm:$0x3f] }
0x1245   :  { %v3909_v11 = vrot.slane %v3902_v1, %v5249_v17  ;;  %v3917_v28 = vrot.slane %v4398_v26, %v5249_v17  ;;  %v3925_v23 = vrot.slane %v3918_v47, %v5249_v17  ;;  %v3933_v15 = vrot.slane %v4399_v63, %v5249_v17 }
0x1246   :  { %v3881_v48 = vrot.slane %v3867_v51, %v5252_v24  ;;  %v3897_v16 = vrot.slane %v3883_v27, %v5252_v24  ;;  %v3874_v18 = vrot.slane %v3866_v46, %v5252_v24  ;;  %v3890_v49 = vrot.slane %v3882_v53, %v5252_v24 }
0x1247   :  { %v3935_v20 = vcombine.high %v3909_v11, %v3917_v28  ;;  %v3951_v43 = vcombine.high %v3925_v23, %v3933_v15  ;;  %v3934_v41 = vcombine.low %v3909_v11, %v3917_v28  ;;  %v3950_v25 = vcombine.low %v3925_v23, %v3933_v15 }
0x1248   :  { %v3900_v56 = vcombine.low %v3881_v48, %v3897_v16  ;;  %v3899_v61 = vcombine.high %v3874_v18, %v3890_v49  ;;  %v3901_v33 = vcombine.high %v3881_v48, %v3897_v16  ;;  %v3898_v59 = vcombine.low %v3874_v18, %v3890_v49  ;;  %v4733_v49 = vld [vmem:[%s6097_s9 + $0x10] sm:$0xff]  }
0x1249   :  { %v3949_v17 = vrot.slane %v3935_v20, %v5252_v24  ;;  %v3965_v37 = vrot.slane %v3951_v43, %v5252_v24  ;;  %v3942_v32 = vrot.slane %v3934_v41, %v5252_v24  ;;  %v3958_v39 = vrot.slane %v3950_v25, %v5252_v24  ;;  %4647 = vmatpush3.bf16.msra.mxu0 %v4733_v49  ;;  %v4734_v20 = vld [vmem:[%s6097_s9 + $0x18] sm:$0xff]   ;;  %v4735_v43 = vld [vmem:[%s6099_s11 + $0x20] sm:$0xff]   ;;  %v4736_v41 = vld [vmem:[%s6099_s11 + $0x28] sm:$0xff]  }
0x124a   :  { %v4009_v3 = vrot.slane %v6015_v36, %v1968_v9  ;;  %4648 = vmatprep.subr.bf16.mxu0 %v4976_v0  ;;  %v4429_v49 = vld [vmem:[#allocation7 + $0x2] ss:$0 sm:$0xff] }
0x124b   :  { %v3968_v57 = vcombine.low %v3949_v17, %v3965_v37  ;;  %v3967_v19 = vcombine.high %v3942_v32, %v3958_v39  ;;  %v3969_v34 = vcombine.high %v3949_v17, %v3965_v37  ;;  %v3966_v4 = vcombine.low %v3942_v32, %v3958_v39 }
0x124c   :  { %v4097_v37 = vrot.slane %v6015_v36, %v2056_v50  ;;  %v4738_v50 = vld [vmem:[%s6099_s11 + $0x38] sm:$0xff]  }
0x124d   :  { %v4707_v62 = vpack.i.bf16 %v3968_v57, %v3900_v56  ;;  %v4702_v13 = vpack.i.bf16 %v3967_v19, %v3899_v61  ;;  %v4712_v60 = vpack.i.bf16 %v3969_v34, %v3901_v33  ;;  %4649 = vmatpush3.bf16.msra.mxu0 %v4734_v20  ;;  %v4103_v34 = vrot.slane %v6015_v36, %v2062_v5 }
0x124f   :  { %4708 = vrot.lane.b32.xlu0 %v4707_v62, %s4971_s3  ;;  %4703 = vrot.lane.b32.xlu1 %v4702_v13, %s4984_s10 }
0x1253   :  { %4713 = vrot.lane.b32.xlu1 %v4712_v60, %s4985_s22 }
0x12c1   :  { %v4709_v24 = vpop.permute.xlu0 %4708  ;;  %v4704_v38 = vpop.permute.xlu1 %4703 }
0x12c2   :  { %v4706_v44 = vunpack.i.h.bf16 %v4704_v38  ;;  %v4705_v45 = vunpack.i.l.bf16 %v4704_v38  ;;  %v4711_v22 = vunpack.i.h.bf16 %v4709_v24  ;;  %v4710_v10 = vunpack.i.l.bf16 %v4709_v24  ;;  %v4737_v24 = vld [vmem:[%s6099_s11 + $0x30] sm:$0xff]   ;;  %s4986_s11 = smov [#allocation11]  }
0x12c3   :  { %v4411_v38 = vld [vmem:[#allocation10 + $0x1] ss:$0 sm:$0xff]  ;;  %s4309_s4 = sshll.u32 %s4986_s11, 4  ;;  %s4310_s4 = int_to_ptr.vmem [resolvable:$true] %s4309_s4 }
0x12c4   :  { %v3994_v42 = vsel %vm1197_vm3, %v3898_v59, %v4705_v45  ;;  %v3995_v21 = vsel %vm1197_vm3, %v3966_v4, %v4706_v44  ;;  %s4937_s18 = scalar_lea.vmem %s4310_s4, 256  ;;  %p4942_p13 = scmp.lt.s32.totalorder %s4310_s4, %s4310_s4 }
0x12c5   :  { %v4714_v54 = vpop.permute.xlu1 %4713  ;;  %v3996_v58 = vsel %vm129_vm1, %v3994_v42, %v4710_v10  ;;  %v3997_v55 = vsel %vm129_vm1, %v3995_v21, %v4711_v22  ;;  %p4938_p12 = scmp.ne.s32.totalorder %s4310_s4, %s4937_s18  ;;  %p4943_p0 = scmp.lt.s32.totalorder %s4937_s18, %s4937_s18 }
0x12c6   :  { %v4716_v8 = vunpack.i.h.bf16 %v4714_v54  ;;  %v4715_v30 = vunpack.i.l.bf16 %v4714_v54 }
0x12c7   :  { %p4944_p1 = por %p4943_p0, %p4942_p13 }
0x12c8   :  { %v3998_v31 = vsel %vm1958_vm4, %v3996_v58, %v4715_v30  ;;  %v3999_v2 = vsel %vm1958_vm4, %v3997_v55, %v4716_v8  ;;  %v4191_v30 = vrot.slane %v6015_v36, %v2147_v29 }
0x12c9   :  { %v4000_v12 = vpack.c.bf16 %v3999_v2, %v3998_v31  ;;  %p4945_p2 = pnand %p4944_p1, %p4938_p12 }
0x12cb   :  { %4643 = vmatmul.mubr.msk.bf16.vlgmr.msra.gmra.mrb[40].mxu1 %vm181_vm2, %v4000_v12 }
0x12cc   :  { %4662 = vmatprep.mubr.msk.bf16.mxu1 %vm4977_vm0, %v4976_v0  ;;  %4655 = vmatpush3.bf16.msra.mxu1 %v4735_v43 }
0x12cd   :  { %4656 = vmatprep.subr.bf16.mxu1 %v4976_v0 }
0x12d0   :  { %4657 = vmatpush3.bf16.msra.mxu1 %v4736_v41 }
0x12d1   :  { %4658 = vmatprep.subr.bf16.mxu1 %v4976_v0 }
0x12d4   :  { %4659 = vmatpush3.bf16.msra.mxu1 %v4737_v24 }
0x12d5   :  { %4660 = vmatprep.subr.bf16.mxu1 %v4976_v0 }
0x12d8   :  { %4661 = vmatpush3.bf16.msra.mxu1 %v4738_v50 }
0x139e   :  { %v4059_v6 = vpop.f32.mrb[40].mxu1 }
0x139f   :  { %v4060_v1 = vadd.f32 %v4059_v6, %v4009_v3  ;;  %v4644_v26 = vpop.f32.mrb[41].mxu1 }
0x13a0   :  { %v4062_v47 = vpop.f32.mrb[42].mxu1 }
0x13a1   :  { %v6021_v63 = vadd.f32 %v4060_v1, %v5614_v7  ;;  %v4063_v51 = vadd.f32 %v4062_v47, %v4009_v3  ;;  %v4645_v27 = vpop.f32.mrb[43].mxu1 }
0x13a3   :  { %v6024_v46 = vadd.f32 %v4063_v51, %v5617_v52  ;;  %v4068_v53 = vsel %vm181_vm2, %v6021_v63, 0.0 }
0x13a4   :  { %4069 = vadd.xlane.f32.xlu1 %v4068_v53 }
0x13a5   :  { %v4071_v14 = vsel %vm181_vm2, %v6024_v46, 0.0 }
0x13a6   :  { %4072 = vadd.xlane.f32.xlu0 %v4071_v14 }
0x1431   :  { %v4070_v9 = vpop.xlane.xlu1 %4069 }
0x1432   :  { %v4074_v11 = vmul.f32 0.03125, %v4070_v9 }
0x1433   :  { %v4073_v28 = vpop.xlane.xlu0 %4072 }
0x1434   :  { %v4076_v23 = vsub.f32 %v6021_v63, %v4074_v11  ;;  %v4075_v7 = vmul.f32 0.03125, %v4073_v28 }
0x1436   :  { %v4077_v15 = vsub.f32 %v6024_v46, %v4075_v7  ;;  %v4078_v48 = vmul.f32 %v4076_v23, %v4076_v23 }
0x1438   :  { %v4080_v52 = vsel %vm181_vm2, %v4078_v48, 0.0  ;;  %v4079_v16 = vmul.f32 %v4077_v15, %v4077_v15 }
0x1439   :  { %4081 = vadd.xlane.f32.xlu0 %v4080_v52  ;;  %v4428_v52 = vld [vmem:[#allocation7 + $0x1] ss:$0 sm:$0xff] }
0x143a   :  { %v4083_v18 = vsel %vm181_vm2, %v4079_v16, 0.0 }
0x143b   :  { %4084 = vadd.xlane.f32.xlu1 %v4083_v18 }
0x14c6   :  { %v4082_v25 = vpop.xlane.xlu0 %4081 }
0x14c7   :  { %v4086_v56 = vmul.f32 0.03125, %v4082_v25 }
0x14c8   :  { %v4085_v61 = vpop.xlane.xlu1 %4084 }
0x14c9   :  { %v4088_v33 = vadd.f32 1e-05, %v4086_v56  ;;  %v4087_v59 = vmul.f32 0.03125, %v4085_v61 }
0x14cb   :  { %4815 = vrsqrt.f32 %v4088_v33  ;;  %v4089_v17 = vadd.f32 1e-05, %v4087_v59 }
0x14cd   :  { %4817 = vrsqrt.f32 %v4089_v17 }
0x14d5   :  { %v4816_v32 = vpop.eup %4815 }
0x14d6   :  { %v4092_v39 = vmul.f32 %v4816_v32, %v4076_v23 }
0x14d7   :  { %v4818_v40 = vpop.eup %4817 }
0x14d8   :  { %v4098_v57 = vmul.f32 %v4097_v37, %v4092_v39  ;;  %v4093_v19 = vmul.f32 %v4818_v40, %v4077_v15 }
0x14da   :  { %v4099_v4 = vmul.f32 %v4097_v37, %v4093_v19  ;;  %v4104_v62 = vadd.f32 %v4103_v34, %v4098_v57 }
0x14dc   :  { %v4105_v13 = vadd.f32 %v4103_v34, %v4099_v4 }
0x14de   :  { %v4106_v60 = vpack.c.bf16 %v4105_v13, %v4104_v62 }
0x14e0   :  { %4651 = vmatmul.mubr.msk.bf16.vlgmr.msra.gmra.mrb[48].mxu0 %vm181_vm2, %v4106_v60 }
0x15b3   :  { %v4169_v5 = vpop.f32.mrb[48].mxu0 }
0x15b4   :  { %v4170_v44 = vadd.f32 %v4411_v38, %v4169_v5  ;;  %v4652_v45 = vpop.f32.mrb[49].mxu0 }
0x15b5   :  { %v4172_v22 = vpop.f32.mrb[50].mxu0 }
0x15b6   :  { %v4173_v10 = vadd.f32 %v4411_v38, %v4172_v22  ;;  %v4653_v42 = vpop.f32.mrb[51].mxu0  ;;  %v4176_v21 = vmax.f32 %v4170_v44, 0.0 }
0x15b8   :  { %v4177_v54 = vmax.f32 %v4173_v10, 0.0 }
0x15ba   :  { %v4178_v8 = vpack.c.bf16 %v4177_v54, %v4176_v21 }
0x15bc   :  { %4663 = vmatmul.mubr.msk.bf16.vlgmr.msra.gmra.mrb[44].mxu1 %vm2173_vm5, %v4178_v8 }
0x168f   :  { %v4253_v58 = vpop.f32.mrb[44].mxu1 }
0x1690   :  { %v4254_v55 = vadd.f32 %v4253_v58, %v4191_v30  ;;  %v4664_v0 = vpop.f32.mrb[45].mxu1 }
0x1691   :  { %v4256_v31 = vpop.f32.mrb[46].mxu1 }
0x1692   :  { %v4260_v2 = vadd.f32 %v4254_v55, %v6021_v63  ;;  %v4257_v12 = vadd.f32 %v4256_v31, %v4191_v30  ;;  %v4665_v3 = vpop.f32.mrb[47].mxu1 }
0x1694   :  { %v4261_v6 = vadd.f32 %v4257_v12, %v6024_v46  ;;  %v4264_v1 = vsel %vm181_vm2, %v4260_v2, 0.0 }
0x1695   :  { %4265 = vadd.xlane.f32.xlu0 %v4264_v1 }
0x1696   :  { %v4267_v26 = vsel %vm181_vm2, %v4261_v6, 0.0 }
0x1697   :  { %4268 = vadd.xlane.f32.xlu1 %v4267_v26 }
0x1722   :  { %v4266_v47 = vpop.xlane.xlu0 %4265 }
0x1723   :  { %v4270_v35 = vmul.f32 0.03125, %v4266_v47 }
0x1724   :  { %v4269_v51 = vpop.xlane.xlu1 %4268 }
0x1725   :  { %v4272_v29 = vsub.f32 %v4260_v2, %v4270_v35  ;;  %v4271_v36 = vmul.f32 0.03125, %v4269_v51 }
0x1727   :  { %v4273_v27 = vsub.f32 %v4261_v6, %v4271_v36  ;;  %v4274_v53 = vmul.f32 %v4272_v29, %v4272_v29 }
0x1729   :  { %v4276_v14 = vsel %vm181_vm2, %v4274_v53, 0.0  ;;  %v4275_v63 = vmul.f32 %v4273_v27, %v4273_v27 }
0x172a   :  { %4277 = vadd.xlane.f32.xlu0 %v4276_v14 }
0x172b   :  { %v4279_v9 = vsel %vm181_vm2, %v4275_v63, 0.0 }
0x172c   :  { %4280 = vadd.xlane.f32.xlu1 %v4279_v9 }
0x17b7   :  { %v4278_v46 = vpop.xlane.xlu0 %4277 }
0x17b8   :  { %v4282_v11 = vmul.f32 0.03125, %v4278_v46 }
0x17b9   :  { %v4281_v28 = vpop.xlane.xlu1 %4280 }
0x17ba   :  { %v4284_v23 = vadd.f32 1e-05, %v4282_v11  ;;  %v4283_v7 = vmul.f32 0.03125, %v4281_v28 }
0x17bc   :  { %4819 = vrsqrt.f32 %v4284_v23  ;;  %v4285_v15 = vadd.f32 1e-05, %v4283_v7 }
0x17be   :  { %4821 = vrsqrt.f32 %v4285_v15 }
0x17c6   :  { %v4820_v48 = vpop.eup %4819 }
0x17c7   :  { %v4288_v16 = vmul.f32 %v4820_v48, %v4272_v29 }
0x17c8   :  { %v4822_v18 = vpop.eup %4821 }
0x17c9   :  { %v4294_v20 = vmul.f32 %v4428_v52, %v4288_v16  ;;  %v4289_v43 = vmul.f32 %v4822_v18, %v4273_v27 }
0x17cb   :  { %v4295_v41 = vmul.f32 %v4428_v52, %v4289_v43  ;;  %v4300_v25 = vadd.f32 %v4429_v49, %v4294_v20 }
0x17cd   :  { %v4301_v56 = vadd.f32 %v4429_v49, %v4295_v41  ;;  %4302 = vst.msk [vmem:[#allocation11] sm:$0xff] %vm181_vm2, %v4300_v25 }
0x17cf   :  { %4303 = vst.msk [vmem:[#allocation11 + $0x8] sm:$0xff] %vm181_vm2, %v4301_v56 }
0x17d0   :  { %4948 = shalt.err (!%p4945_p2)
}
0x17d1   :  { %s4949_s2 = scalar_lea.hbm %s6100_s12, 256 }
0x17d2   :  { %p4950_p3 = scmp.ne.s32.totalorder %s6100_s12, %s4949_s2  ;;  %p4953_p4 = scmp.lt.u32.totalorder %s4949_s2, %s6100_s12 }
0x17d4   :  { %p4955_p5 = pnand %p4953_p4, %p4950_p3 }
0x17d6   :  { %4958 = shalt.err (!%p4955_p5)
}
0x17d7   :  { %s4987_s26 = smov 128  }
0x17d8   :  { %4315 = dma.vmem_to_hbm [thread:$0]  %s4310_s4, 256, %s6100_s12, [#allocation4], %s4987_s26, %s4987_s26, %s4984_s10  }
0x17d9   :  { %4965 = dma.done.wait [#allocation4], 256  }
0x17da   :  { %4966 = vsyncadd [#allocation4], 4294967040 }
0x17db   :  { %4319 = vsyncpa [#allocation3], 1 }
0x17dc   :  { %4320 = vsyncpa [#allocation6], 1 }
0x17dd   :  { %4321 = vsyncpa [#allocation9], 1 }
0x17de   :  { %4322 = vsyncpa [#allocation4], 1 }

</bundles_post_ra>
